<compile_context>
chip_gen: v6e
topology: v6e:2x2x1
jax: 0.10.0
libtpu: 0.0.40
codegen_flags: <defaults>
</compile_context>

<pallas_src>
import math
import functools

import jax
import jax.numpy as jnp
from jax.experimental import pallas as pl
from jax.experimental.pallas import tpu as pltpu


def _layernorm(x, w, b, eps=1e-5):
    # x: (N, E); w, b: (1, E)  -- matches torch.nn.LayerNorm(eps=1e-5)
    mu = jnp.mean(x, axis=-1, keepdims=True)
    var = jnp.mean((x - mu) ** 2, axis=-1, keepdims=True)
    return (x - mu) * jax.lax.rsqrt(var + eps) * w + b


# ---------------------------------------------------------------------------
# Fused kernel: step 0 does embedding(one-hot matmul) + LN + add, every step
# runs one post-norm nn.TransformerEncoderLayer on the resident activation.
# ---------------------------------------------------------------------------
def fused_forward_kernel(gid_ref, bin_ref, emb_ref,
                         lgw_ref, lgb_ref, lbw_ref, lbb_ref,
                         wqkv_ref, bqkv_ref, wo_ref, bo_ref,
                         ln1w_ref, ln1b_ref, w1_ref, b1_ref,
                         w2_ref, b2_ref, ln2w_ref, ln2b_ref,
                         o_ref, *, B, T, E, n_heads, vocab_size):
    layer = pl.program_id(0)
    BT = B * T
    hd = E // n_heads
    scale = 1.0 / math.sqrt(hd)

    # ---- step 0: fused embedding gather + LayerNorms + add ---------------
    @pl.when(layer == 0)
    def _():
        emb = emb_ref[...]                                          # (V, E)
        iota = jax.lax.broadcasted_iota(jnp.int32, (BT, vocab_size), 1)
        oh_g = (gid_ref[...] == iota).astype(jnp.float32)           # (BT, V)
        oh_b = (bin_ref[...] == iota).astype(jnp.float32)
        g_emb = jnp.dot(oh_g, emb, preferred_element_type=jnp.float32)
        b_emb = jnp.dot(oh_b, emb, preferred_element_type=jnp.float32)
        xg = _layernorm(g_emb, lgw_ref[...], lgb_ref[...])
        xb = _layernorm(b_emb, lbw_ref[...], lbb_ref[...])
        # TODO(synk): dropout(p=0.1, training=True) -> identity here.
        o_ref[...] = xg + xb

    x = o_ref[...]                                                  # (BT, E)

    # ---- multi-head self-attention (full-slab QKV projection) ------------
    qkv = jnp.dot(x, wqkv_ref[...], preferred_element_type=jnp.float32)
    qkv = qkv + bqkv_ref[...]                                       # (BT, 3E)
    q = qkv[:, :E].reshape(B, T, E)
    k = qkv[:, E:2 * E].reshape(B, T, E)
    v = qkv[:, 2 * E:].reshape(B, T, E)

    attn = jnp.zeros((BT, E), jnp.float32)
    for h in range(n_heads):
        sl = slice(h * hd, (h + 1) * hd)
        qh = q[:, :, sl] * scale                                    # (B, T, hd)
        kh = k[:, :, sl]
        vh = v[:, :, sl]
        s = jnp.einsum('bqd,bkd->bqk', qh, kh,
                       preferred_element_type=jnp.float32)          # (B, T, T)
        s = s - jnp.max(s, axis=-1, keepdims=True)
        p = jnp.exp(s)
        p = p * pl.reciprocal(jnp.sum(p, axis=-1, keepdims=True), approx=True)
        oh = jnp.einsum('bqk,bkd->bqd', p, vh,
                        preferred_element_type=jnp.float32)         # (B, T, hd)
        # Fold the head-concat into the output projection: accumulate
        # (BT, hd) @ (hd, E) slices of wo.
        attn = attn + jnp.dot(oh.reshape(BT, hd), wo_ref[h * hd:(h + 1) * hd, :],
                              preferred_element_type=jnp.float32)
    attn = attn + bo_ref[...]

    # ---- residual + LayerNorm 1 ------------------------------------------
    h1 = _layernorm(x + attn, ln1w_ref[...], ln1b_ref[...])

    # ---- feed-forward: linear -> relu -> linear ---------------------------
    f = jnp.dot(h1, w1_ref[...], preferred_element_type=jnp.float32) + b1_ref[...]
    f = jnp.maximum(f, 0.0)
    f = jnp.dot(f, w2_ref[...], preferred_element_type=jnp.float32) + b2_ref[...]

    # ---- residual + LayerNorm 2 -------------------------------------------
    o_ref[...] = _layernorm(h1 + f, ln2w_ref[...], ln2b_ref[...])


def make_fused_forward(B, T, E, H, n_heads, n_layers, vocab_size):
    BT = B * T

    def const_spec(shape):
        nd = len(shape)
        return pl.BlockSpec(shape, lambda l, _nd=nd: (0,) * _nd)

    def layer_spec(shape):   # shape excludes the leading (n_layers,) axis
        nd = len(shape)
        return pl.BlockSpec((None,) + shape, lambda l, _nd=nd: (l,) + (0,) * _nd)

    kernel = functools.partial(fused_forward_kernel, B=B, T=T, E=E,
                               n_heads=n_heads, vocab_size=vocab_size)
    return pl.pallas_call(
        kernel,
        out_shape=jax.ShapeDtypeStruct((BT, E), jnp.float32),
        grid=(n_layers,),
        in_specs=[
            const_spec((BT, 1)), const_spec((BT, 1)),          # gid / bin ids
            const_spec((vocab_size, E)),                       # emb_gid table
            const_spec((1, E)), const_spec((1, E)),            # ln_gid w, b
            const_spec((1, E)), const_spec((1, E)),            # ln_bin w, b
            layer_spec((E, 3 * E)), layer_spec((1, 3 * E)),    # in_proj W, b
            layer_spec((E, E)), layer_spec((1, E)),            # out_proj W, b
            layer_spec((1, E)), layer_spec((1, E)),            # ln1 w, b
            layer_spec((E, H)), layer_spec((1, H)),            # linear1 W, b
            layer_spec((H, E)), layer_spec((1, E)),            # linear2 W, b
            layer_spec((1, E)), layer_spec((1, E)),            # ln2 w, b
        ],
        out_specs=pl.BlockSpec((BT, E), lambda l: (0, 0)),     # resident activation
        compiler_params=pltpu.CompilerParams(
            dimension_semantics=("arbitrary",)),
    )


# ---------------------------------------------------------------------------
# Parameter init (deterministic, shapes from MicroSCGPT.__init__; per-layer
# weights stacked along a leading (n_layers, ...) axis for the fused kernel).
# ---------------------------------------------------------------------------
def init_params(key, vocab_size, bins_size, E, H, n_layers):
    keys = jax.random.split(key, 10)
    rnd = lambda k, shape, s=0.05: (s * jax.random.normal(k, shape)).astype(jnp.float32)
    L = n_layers
    return {
        "emb_gid": rnd(keys[0], (vocab_size, E), 0.02),
        # emb_bin exists in the module but is unused by forward (it calls
        # emb_gid on x_bin) — kept only for parameter-shape fidelity.
        "emb_bin": rnd(keys[1], (bins_size, E), 0.02),
        "ln_gid_w": jnp.ones((1, E), jnp.float32),
        "ln_gid_b": jnp.zeros((1, E), jnp.float32),
        "ln_bin_w": jnp.ones((1, E), jnp.float32),
        "ln_bin_b": jnp.zeros((1, E), jnp.float32),
        "wqkv": rnd(keys[2], (L, E, 3 * E)),
        "bqkv": rnd(keys[3], (L, 1, 3 * E)),
        "wo":   rnd(keys[4], (L, E, E)),
        "bo":   rnd(keys[5], (L, 1, E)),
        "ln1w": jnp.ones((L, 1, E), jnp.float32),
        "ln1b": jnp.zeros((L, 1, E), jnp.float32),
        "w1":   rnd(keys[6], (L, E, H)),
        "b1":   rnd(keys[7], (L, 1, H)),
        "w2":   rnd(keys[8], (L, H, E)),
        "b2":   rnd(keys[9], (L, 1, E)),
        "ln2w": jnp.ones((L, 1, E), jnp.float32),
        "ln2b": jnp.zeros((L, 1, E), jnp.float32),
    }


# ---------------------------------------------------------------------------
# Forward (mirrors MicroSCGPT.forward) — one pallas_call for everything.
# ---------------------------------------------------------------------------
def micro_scgpt_forward(params, x_gid, x_bin, *, E, H, n_heads, n_layers,
                        vocab_size):
    B, T = x_gid.shape
    fwd = make_fused_forward(B, T, E, H, n_heads, n_layers, vocab_size)
    out = fwd(
        x_gid.reshape(B * T, 1).astype(jnp.int32),
        x_bin.reshape(B * T, 1).astype(jnp.int32),
        params["emb_gid"],
        params["ln_gid_w"], params["ln_gid_b"],
        params["ln_bin_w"], params["ln_bin_b"],
        params["wqkv"], params["bqkv"], params["wo"], params["bo"],
        params["ln1w"], params["ln1b"],
        params["w1"], params["b1"], params["w2"], params["b2"],
        params["ln2w"], params["ln2b"],
    )
    return out.reshape(B, T, E)


if __name__ == "__main__":
    # Small shapes consistent with the module (embed/hidden/heads/layers are
    # the nn.Module defaults; E=128 keeps every tile lane-dense).
    B, T = 2, 8                      # batch, ctx_size
    vocab_size, bins_size = 50, 10
    E, H = 128, 128                  # embed_size, trans_hidden_size
    n_heads, n_layers = 4, 4

    key = jax.random.PRNGKey(0)
    kp, kg, kb = jax.random.split(key, 3)
    params = init_params(kp, vocab_size, bins_size, E, H, n_layers)

    x_gid = jax.random.randint(kg, (B, T), 0, vocab_size, dtype=jnp.int32)
    x_bin = jax.random.randint(kb, (B, T), 0, bins_size, dtype=jnp.int32)

    fwd = jax.jit(functools.partial(micro_scgpt_forward, E=E, H=H,
                                    n_heads=n_heads, n_layers=n_layers,
                                    vocab_size=vocab_size))
    out = fwd(params, x_gid, x_bin)
    out = jax.block_until_ready(out)
    assert out.shape == (B, T, E) and out.dtype == jnp.float32
    assert bool(jnp.all(jnp.isfinite(out)))
    print("KERNEL_OK")
</pallas_src>

<mosaic_0001>
module attributes {stable_mosaic.version = 11 : i64} {
  func.func @fused_forward_kernel(%arg0: i32, %arg1: memref<16x1xi32, #tpu.memory_space<vmem>>, %arg2: memref<16x1xi32, #tpu.memory_space<vmem>>, %arg3: memref<50x128xf32, #tpu.memory_space<vmem>>, %arg4: memref<1x128xf32, #tpu.memory_space<vmem>>, %arg5: memref<1x128xf32, #tpu.memory_space<vmem>>, %arg6: memref<1x128xf32, #tpu.memory_space<vmem>>, %arg7: memref<1x128xf32, #tpu.memory_space<vmem>>, %arg8: memref<1x128x384xf32, #tpu.memory_space<vmem>>, %arg9: memref<1x1x384xf32, #tpu.memory_space<vmem>>, %arg10: memref<1x128x128xf32, #tpu.memory_space<vmem>>, %arg11: memref<1x1x128xf32, #tpu.memory_space<vmem>>, %arg12: memref<1x1x128xf32, #tpu.memory_space<vmem>>, %arg13: memref<1x1x128xf32, #tpu.memory_space<vmem>>, %arg14: memref<1x128x128xf32, #tpu.memory_space<vmem>>, %arg15: memref<1x1x128xf32, #tpu.memory_space<vmem>>, %arg16: memref<1x128x128xf32, #tpu.memory_space<vmem>>, %arg17: memref<1x1x128xf32, #tpu.memory_space<vmem>>, %arg18: memref<1x1x128xf32, #tpu.memory_space<vmem>>, %arg19: memref<1x1x128xf32, #tpu.memory_space<vmem>>, %arg20: memref<16x128xf32, #tpu.memory_space<vmem>>) attributes {dimension_semantics = [#tpu.dimension_semantics<arbitrary>], iteration_bounds = array<i64: 4>, scalar_prefetch = 0 : i64, scratch_operands = 0 : i64, tpu.core_type = #tpu.core_type<tc>, window_params = [{pipeline_mode = #tpu.pipeline_mode<synchronous>, transform_indices = @transform_0, window_bounds = array<i64: 16, 1>}, {pipeline_mode = #tpu.pipeline_mode<synchronous>, transform_indices = @transform_1, window_bounds = array<i64: 16, 1>}, {pipeline_mode = #tpu.pipeline_mode<synchronous>, transform_indices = @transform_2, window_bounds = array<i64: 50, 128>}, {pipeline_mode = #tpu.pipeline_mode<synchronous>, transform_indices = @transform_3, window_bounds = array<i64: 1, 128>}, {pipeline_mode = #tpu.pipeline_mode<synchronous>, transform_indices = @transform_4, window_bounds = array<i64: 1, 128>}, {pipeline_mode = #tpu.pipeline_mode<synchronous>, transform_indices = @transform_5, window_bounds = array<i64: 1, 128>}, {pipeline_mode = #tpu.pipeline_mode<synchronous>, transform_indices = @transform_6, window_bounds = array<i64: 1, 128>}, {transform_indices = @transform_7, window_bounds = array<i64: 1, 128, 384>}, {transform_indices = @transform_8, window_bounds = array<i64: 1, 1, 384>}, {transform_indices = @transform_9, window_bounds = array<i64: 1, 128, 128>}, {transform_indices = @transform_10, window_bounds = array<i64: 1, 1, 128>}, {transform_indices = @transform_11, window_bounds = array<i64: 1, 1, 128>}, {transform_indices = @transform_12, window_bounds = array<i64: 1, 1, 128>}, {transform_indices = @transform_13, window_bounds = array<i64: 1, 128, 128>}, {transform_indices = @transform_14, window_bounds = array<i64: 1, 1, 128>}, {transform_indices = @transform_15, window_bounds = array<i64: 1, 128, 128>}, {transform_indices = @transform_16, window_bounds = array<i64: 1, 1, 128>}, {transform_indices = @transform_17, window_bounds = array<i64: 1, 1, 128>}, {transform_indices = @transform_18, window_bounds = array<i64: 1, 1, 128>}, {pipeline_mode = #tpu.pipeline_mode<synchronous>, transform_indices = @transform_19, window_bounds = array<i64: 16, 128>}]} {
    %c0_i32 = arith.constant 0 : i32
    %0 = arith.cmpi eq, %arg0, %c0_i32 : i32
    %1 = arith.extui %0 : i1 to i32
    %c0_i32_0 = arith.constant 0 : i32
    %2 = arith.cmpi ne, %1, %c0_i32_0 : i32
    scf.if %2 {
      %c0_84 = arith.constant 0 : index
      %c0_85 = arith.constant 0 : index
      %181 = vector.load %arg3[%c0_84, %c0_85] : memref<50x128xf32, #tpu.memory_space<vmem>>, vector<50x128xf32>
      %182 = tpu.iota {dimensions = array<i32: 1>} : vector<16x50xi32>
      %c0_86 = arith.constant 0 : index
      %c0_87 = arith.constant 0 : index
      %183 = vector.load %arg1[%c0_86, %c0_87] : memref<16x1xi32, #tpu.memory_space<vmem>>, vector<16x1xi32>
      %184 = vector.broadcast %183 : vector<16x1xi32> to vector<16x50xi32>
      %185 = arith.cmpi eq, %184, %182 : vector<16x50xi32>
      %186 = arith.extui %185 : vector<16x50xi1> to vector<16x50xi32>
      %187 = arith.sitofp %186 : vector<16x50xi32> to vector<16x50xf32>
      %c0_88 = arith.constant 0 : index
      %c0_89 = arith.constant 0 : index
      %188 = vector.load %arg2[%c0_88, %c0_89] : memref<16x1xi32, #tpu.memory_space<vmem>>, vector<16x1xi32>
      %189 = vector.broadcast %188 : vector<16x1xi32> to vector<16x50xi32>
      %190 = arith.cmpi eq, %189, %182 : vector<16x50xi32>
      %191 = arith.extui %190 : vector<16x50xi1> to vector<16x50xi32>
      %192 = arith.sitofp %191 : vector<16x50xi32> to vector<16x50xf32>
      %cst_90 = arith.constant dense<0.000000e+00> : vector<16x128xf32>
      %193 = tpu.matmul %187, %181, %cst_90 {dimension_numbers = #tpu.dot_dimension_numbers<[1], [0], [0], [1], [0, 0, 1, 1], [], []>} : vector<16x50xf32>, vector<50x128xf32>, vector<16x128xf32> -> vector<16x128xf32>
      %cst_91 = arith.constant dense<0.000000e+00> : vector<16x128xf32>
      %194 = tpu.matmul %192, %181, %cst_91 {dimension_numbers = #tpu.dot_dimension_numbers<[1], [0], [0], [1], [0, 0, 1, 1], [], []>} : vector<16x50xf32>, vector<50x128xf32>, vector<16x128xf32> -> vector<16x128xf32>
      %c0_92 = arith.constant 0 : index
      %c0_93 = arith.constant 0 : index
      %195 = vector.load %arg4[%c0_92, %c0_93] : memref<1x128xf32, #tpu.memory_space<vmem>>, vector<1x128xf32>
      %c0_94 = arith.constant 0 : index
      %c0_95 = arith.constant 0 : index
      %196 = vector.load %arg5[%c0_94, %c0_95] : memref<1x128xf32, #tpu.memory_space<vmem>>, vector<1x128xf32>
      %cst_96 = arith.constant dense<0.000000e+00> : vector<16xf32>
      %197 = vector.multi_reduction <add>, %193, %cst_96 [1] : vector<16x128xf32> to vector<16xf32>
      %198 = vector.shape_cast %197 : vector<16xf32> to vector<16x1xf32>
      %cst_97 = arith.constant 1.280000e+02 : f32
      %199 = vector.broadcast %cst_97 : f32 to vector<16x1xf32>
      %200 = arith.divf %198, %199 : vector<16x1xf32>
      %201 = vector.broadcast %200 : vector<16x1xf32> to vector<16x128xf32>
      %202 = arith.subf %193, %201 : vector<16x128xf32>
      %203 = arith.mulf %202, %202 : vector<16x128xf32>
      %cst_98 = arith.constant dense<0.000000e+00> : vector<16xf32>
      %204 = vector.multi_reduction <add>, %203, %cst_98 [1] : vector<16x128xf32> to vector<16xf32>
      %205 = vector.shape_cast %204 : vector<16xf32> to vector<16x1xf32>
      %cst_99 = arith.constant 1.280000e+02 : f32
      %206 = vector.broadcast %cst_99 : f32 to vector<16x1xf32>
      %207 = arith.divf %205, %206 : vector<16x1xf32>
      %208 = vector.broadcast %200 : vector<16x1xf32> to vector<16x128xf32>
      %209 = arith.subf %193, %208 : vector<16x128xf32>
      %cst_100 = arith.constant 9.99999974E-6 : f32
      %210 = vector.broadcast %cst_100 : f32 to vector<16x1xf32>
      %211 = arith.addf %207, %210 : vector<16x1xf32>
      %212 = math.rsqrt %211 : vector<16x1xf32>
      %213 = vector.broadcast %212 : vector<16x1xf32> to vector<16x128xf32>
      %214 = arith.mulf %209, %213 : vector<16x128xf32>
      %215 = vector.broadcast %195 : vector<1x128xf32> to vector<16x128xf32>
      %216 = arith.mulf %214, %215 : vector<16x128xf32>
      %217 = vector.broadcast %196 : vector<1x128xf32> to vector<16x128xf32>
      %218 = arith.addf %216, %217 : vector<16x128xf32>
      %c0_101 = arith.constant 0 : index
      %c0_102 = arith.constant 0 : index
      %219 = vector.load %arg6[%c0_101, %c0_102] : memref<1x128xf32, #tpu.memory_space<vmem>>, vector<1x128xf32>
      %c0_103 = arith.constant 0 : index
      %c0_104 = arith.constant 0 : index
      %220 = vector.load %arg7[%c0_103, %c0_104] : memref<1x128xf32, #tpu.memory_space<vmem>>, vector<1x128xf32>
      %cst_105 = arith.constant dense<0.000000e+00> : vector<16xf32>
      %221 = vector.multi_reduction <add>, %194, %cst_105 [1] : vector<16x128xf32> to vector<16xf32>
      %222 = vector.shape_cast %221 : vector<16xf32> to vector<16x1xf32>
      %cst_106 = arith.constant 1.280000e+02 : f32
      %223 = vector.broadcast %cst_106 : f32 to vector<16x1xf32>
      %224 = arith.divf %222, %223 : vector<16x1xf32>
      %225 = vector.broadcast %224 : vector<16x1xf32> to vector<16x128xf32>
      %226 = arith.subf %194, %225 : vector<16x128xf32>
      %227 = arith.mulf %226, %226 : vector<16x128xf32>
      %cst_107 = arith.constant dense<0.000000e+00> : vector<16xf32>
      %228 = vector.multi_reduction <add>, %227, %cst_107 [1] : vector<16x128xf32> to vector<16xf32>
      %229 = vector.shape_cast %228 : vector<16xf32> to vector<16x1xf32>
      %cst_108 = arith.constant 1.280000e+02 : f32
      %230 = vector.broadcast %cst_108 : f32 to vector<16x1xf32>
      %231 = arith.divf %229, %230 : vector<16x1xf32>
      %232 = vector.broadcast %224 : vector<16x1xf32> to vector<16x128xf32>
      %233 = arith.subf %194, %232 : vector<16x128xf32>
      %cst_109 = arith.constant 9.99999974E-6 : f32
      %234 = vector.broadcast %cst_109 : f32 to vector<16x1xf32>
      %235 = arith.addf %231, %234 : vector<16x1xf32>
      %236 = math.rsqrt %235 : vector<16x1xf32>
      %237 = vector.broadcast %236 : vector<16x1xf32> to vector<16x128xf32>
      %238 = arith.mulf %233, %237 : vector<16x128xf32>
      %239 = vector.broadcast %219 : vector<1x128xf32> to vector<16x128xf32>
      %240 = arith.mulf %238, %239 : vector<16x128xf32>
      %241 = vector.broadcast %220 : vector<1x128xf32> to vector<16x128xf32>
      %242 = arith.addf %240, %241 : vector<16x128xf32>
      %243 = arith.addf %218, %242 : vector<16x128xf32>
      %c0_110 = arith.constant 0 : index
      %c0_111 = arith.constant 0 : index
      %244 = vector.load %arg20[%c0_110, %c0_111] : memref<16x128xf32, #tpu.memory_space<vmem>>, vector<16x128xf32>
      tpu.vector_store %arg20[%c0_110, %c0_111], %243 {strides = array<i32>} : memref<16x128xf32, #tpu.memory_space<vmem>>, vector<16x128xf32>,
    } else {
    }
    %c0 = arith.constant 0 : index
    %c0_1 = arith.constant 0 : index
    %3 = vector.load %arg20[%c0, %c0_1] : memref<16x128xf32, #tpu.memory_space<vmem>>, vector<16x128xf32>
    %c0_2 = arith.constant 0 : index
    %c0_3 = arith.constant 0 : index
    %c0_4 = arith.constant 0 : index
    %4 = vector.load %arg8[%c0_2, %c0_3, %c0_4] : memref<1x128x384xf32, #tpu.memory_space<vmem>>, vector<1x128x384xf32>
    %5 = vector.shape_cast %4 : vector<1x128x384xf32> to vector<128x384xf32>
    %cst = arith.constant dense<0.000000e+00> : vector<16x384xf32>
    %6 = tpu.matmul %3, %5, %cst {dimension_numbers = #tpu.dot_dimension_numbers<[1], [0], [0], [1], [0, 0, 1, 1], [], []>} : vector<16x128xf32>, vector<128x384xf32>, vector<16x384xf32> -> vector<16x384xf32>
    %c0_5 = arith.constant 0 : index
    %c0_6 = arith.constant 0 : index
    %c0_7 = arith.constant 0 : index
    %7 = vector.load %arg9[%c0_5, %c0_6, %c0_7] : memref<1x1x384xf32, #tpu.memory_space<vmem>>, vector<1x1x384xf32>
    %8 = vector.shape_cast %7 : vector<1x1x384xf32> to vector<1x384xf32>
    %9 = vector.broadcast %8 : vector<1x384xf32> to vector<16x384xf32>
    %10 = arith.addf %6, %9 : vector<16x384xf32>
    %11 = vector.extract_strided_slice %10 {offsets = [0, 0], sizes = [16, 128], strides = [1, 1]} : vector<16x384xf32> to vector<16x128xf32>
    %12 = vector.shape_cast %11 : vector<16x128xf32> to vector<2x8x128xf32>
    %13 = vector.extract_strided_slice %10 {offsets = [0, 128], sizes = [16, 128], strides = [1, 1]} : vector<16x384xf32> to vector<16x128xf32>
    %14 = vector.shape_cast %13 : vector<16x128xf32> to vector<2x8x128xf32>
    %15 = vector.extract_strided_slice %10 {offsets = [0, 256], sizes = [16, 128], strides = [1, 1]} : vector<16x384xf32> to vector<16x128xf32>
    %16 = vector.shape_cast %15 : vector<16x128xf32> to vector<2x8x128xf32>
    %cst_8 = arith.constant 0.000000e+00 : f32
    %17 = vector.broadcast %cst_8 : f32 to vector<16x128xf32>
    %18 = vector.extract_strided_slice %12 {offsets = [0, 0, 0], sizes = [2, 8, 32], strides = [1, 1, 1]} : vector<2x8x128xf32> to vector<2x8x32xf32>
    %cst_9 = arith.constant 0.176776692 : f32
    %19 = vector.broadcast %cst_9 : f32 to vector<2x8x32xf32>
    %20 = arith.mulf %18, %19 : vector<2x8x32xf32>
    %21 = vector.extract_strided_slice %14 {offsets = [0, 0, 0], sizes = [2, 8, 32], strides = [1, 1, 1]} : vector<2x8x128xf32> to vector<2x8x32xf32>
    %22 = vector.extract_strided_slice %16 {offsets = [0, 0, 0], sizes = [2, 8, 32], strides = [1, 1, 1]} : vector<2x8x128xf32> to vector<2x8x32xf32>
    "tpu.trace_start"() <{level = 10 : i32, message = "bqd,bkd->bqk"}> : () -> ()
    %cst_10 = arith.constant dense<0.000000e+00> : vector<2x8x8xf32>
    %23 = tpu.matmul %20, %21, %cst_10 {dimension_numbers = #tpu.dot_dimension_numbers<[2], [2], [1], [1], [0, 0, 0, 1, 1, 1], [0], [0]>} : vector<2x8x32xf32>, vector<2x8x32xf32>, vector<2x8x8xf32> -> vector<2x8x8xf32>
    "tpu.trace_stop"() : () -> ()
    %cst_11 = arith.constant dense<0xFF800000> : vector<2x8xf32>
    %24 = vector.multi_reduction <maximumf>, %23, %cst_11 [2] : vector<2x8x8xf32> to vector<2x8xf32>
    %25 = vector.shape_cast %24 : vector<2x8xf32> to vector<2x8x1xf32>
    %26 = vector.broadcast %25 : vector<2x8x1xf32> to vector<2x8x8xf32>
    %27 = arith.subf %23, %26 : vector<2x8x8xf32>
    %28 = math.exp %27 : vector<2x8x8xf32>
    %cst_12 = arith.constant dense<0.000000e+00> : vector<2x8xf32>
    %29 = vector.multi_reduction <add>, %28, %cst_12 [2] : vector<2x8x8xf32> to vector<2x8xf32>
    %30 = vector.shape_cast %29 : vector<2x8xf32> to vector<2x8x1xf32>
    %31 = tpu.reciprocal %30 {approx = true} : vector<2x8x1xf32> -> vector<2x8x1xf32>
    %32 = vector.broadcast %31 : vector<2x8x1xf32> to vector<2x8x8xf32>
    %33 = arith.mulf %28, %32 : vector<2x8x8xf32>
    "tpu.trace_start"() <{level = 10 : i32, message = "bqk,bkd->bqd"}> : () -> ()
    %cst_13 = arith.constant dense<0.000000e+00> : vector<2x8x32xf32>
    %34 = tpu.matmul %33, %22, %cst_13 {dimension_numbers = #tpu.dot_dimension_numbers<[2], [1], [1], [2], [0, 0, 0, 1, 1, 2], [0], [0]>} : vector<2x8x8xf32>, vector<2x8x32xf32>, vector<2x8x32xf32> -> vector<2x8x32xf32>
    "tpu.trace_stop"() : () -> ()
    %35 = vector.shape_cast %34 : vector<2x8x32xf32> to vector<16x32xf32>
    %c0_14 = arith.constant 0 : index
    %c0_15 = arith.constant 0 : index
    %c0_16 = arith.constant 0 : index
    %36 = vector.load %arg10[%c0_14, %c0_15, %c0_16] : memref<1x128x128xf32, #tpu.memory_space<vmem>>, vector<1x32x128xf32>
    %37 = vector.shape_cast %36 : vector<1x32x128xf32> to vector<32x128xf32>
    %cst_17 = arith.constant dense<0.000000e+00> : vector<16x128xf32>
    %38 = tpu.matmul %35, %37, %cst_17 {dimension_numbers = #tpu.dot_dimension_numbers<[1], [0], [0], [1], [0, 0, 1, 1], [], []>} : vector<16x32xf32>, vector<32x128xf32>, vector<16x128xf32> -> vector<16x128xf32>
    %39 = arith.addf %17, %38 : vector<16x128xf32>
    %40 = vector.extract_strided_slice %12 {offsets = [0, 0, 32], sizes = [2, 8, 32], strides = [1, 1, 1]} : vector<2x8x128xf32> to vector<2x8x32xf32>
    %cst_18 = arith.constant 0.176776692 : f32
    %41 = vector.broadcast %cst_18 : f32 to vector<2x8x32xf32>
    %42 = arith.mulf %40, %41 : vector<2x8x32xf32>
    %43 = vector.extract_strided_slice %14 {offsets = [0, 0, 32], sizes = [2, 8, 32], strides = [1, 1, 1]} : vector<2x8x128xf32> to vector<2x8x32xf32>
    %44 = vector.extract_strided_slice %16 {offsets = [0, 0, 32], sizes = [2, 8, 32], strides = [1, 1, 1]} : vector<2x8x128xf32> to vector<2x8x32xf32>
    "tpu.trace_start"() <{level = 10 : i32, message = "bqd,bkd->bqk"}> : () -> ()
    %cst_19 = arith.constant dense<0.000000e+00> : vector<2x8x8xf32>
    %45 = tpu.matmul %42, %43, %cst_19 {dimension_numbers = #tpu.dot_dimension_numbers<[2], [2], [1], [1], [0, 0, 0, 1, 1, 1], [0], [0]>} : vector<2x8x32xf32>, vector<2x8x32xf32>, vector<2x8x8xf32> -> vector<2x8x8xf32>
    "tpu.trace_stop"() : () -> ()
    %cst_20 = arith.constant dense<0xFF800000> : vector<2x8xf32>
    %46 = vector.multi_reduction <maximumf>, %45, %cst_20 [2] : vector<2x8x8xf32> to vector<2x8xf32>
    %47 = vector.shape_cast %46 : vector<2x8xf32> to vector<2x8x1xf32>
    %48 = vector.broadcast %47 : vector<2x8x1xf32> to vector<2x8x8xf32>
    %49 = arith.subf %45, %48 : vector<2x8x8xf32>
    %50 = math.exp %49 : vector<2x8x8xf32>
    %cst_21 = arith.constant dense<0.000000e+00> : vector<2x8xf32>
    %51 = vector.multi_reduction <add>, %50, %cst_21 [2] : vector<2x8x8xf32> to vector<2x8xf32>
    %52 = vector.shape_cast %51 : vector<2x8xf32> to vector<2x8x1xf32>
    %53 = tpu.reciprocal %52 {approx = true} : vector<2x8x1xf32> -> vector<2x8x1xf32>
    %54 = vector.broadcast %53 : vector<2x8x1xf32> to vector<2x8x8xf32>
    %55 = arith.mulf %50, %54 : vector<2x8x8xf32>
    "tpu.trace_start"() <{level = 10 : i32, message = "bqk,bkd->bqd"}> : () -> ()
    %cst_22 = arith.constant dense<0.000000e+00> : vector<2x8x32xf32>
    %56 = tpu.matmul %55, %44, %cst_22 {dimension_numbers = #tpu.dot_dimension_numbers<[2], [1], [1], [2], [0, 0, 0, 1, 1, 2], [0], [0]>} : vector<2x8x8xf32>, vector<2x8x32xf32>, vector<2x8x32xf32> -> vector<2x8x32xf32>
    "tpu.trace_stop"() : () -> ()
    %57 = vector.shape_cast %56 : vector<2x8x32xf32> to vector<16x32xf32>
    %c0_23 = arith.constant 0 : index
    %c32 = arith.constant 32 : index
    %c0_24 = arith.constant 0 : index
    %58 = vector.load %arg10[%c0_23, %c32, %c0_24] : memref<1x128x128xf32, #tpu.memory_space<vmem>>, vector<1x32x128xf32>
    %59 = vector.shape_cast %58 : vector<1x32x128xf32> to vector<32x128xf32>
    %cst_25 = arith.constant dense<0.000000e+00> : vector<16x128xf32>
    %60 = tpu.matmul %57, %59, %cst_25 {dimension_numbers = #tpu.dot_dimension_numbers<[1], [0], [0], [1], [0, 0, 1, 1], [], []>} : vector<16x32xf32>, vector<32x128xf32>, vector<16x128xf32> -> vector<16x128xf32>
    %61 = arith.addf %39, %60 : vector<16x128xf32>
    %62 = vector.extract_strided_slice %12 {offsets = [0, 0, 64], sizes = [2, 8, 32], strides = [1, 1, 1]} : vector<2x8x128xf32> to vector<2x8x32xf32>
    %cst_26 = arith.constant 0.176776692 : f32
    %63 = vector.broadcast %cst_26 : f32 to vector<2x8x32xf32>
    %64 = arith.mulf %62, %63 : vector<2x8x32xf32>
    %65 = vector.extract_strided_slice %14 {offsets = [0, 0, 64], sizes = [2, 8, 32], strides = [1, 1, 1]} : vector<2x8x128xf32> to vector<2x8x32xf32>
    %66 = vector.extract_strided_slice %16 {offsets = [0, 0, 64], sizes = [2, 8, 32], strides = [1, 1, 1]} : vector<2x8x128xf32> to vector<2x8x32xf32>
    "tpu.trace_start"() <{level = 10 : i32, message = "bqd,bkd->bqk"}> : () -> ()
    %cst_27 = arith.constant dense<0.000000e+00> : vector<2x8x8xf32>
    %67 = tpu.matmul %64, %65, %cst_27 {dimension_numbers = #tpu.dot_dimension_numbers<[2], [2], [1], [1], [0, 0, 0, 1, 1, 1], [0], [0]>} : vector<2x8x32xf32>, vector<2x8x32xf32>, vector<2x8x8xf32> -> vector<2x8x8xf32>
    "tpu.trace_stop"() : () -> ()
    %cst_28 = arith.constant dense<0xFF800000> : vector<2x8xf32>
    %68 = vector.multi_reduction <maximumf>, %67, %cst_28 [2] : vector<2x8x8xf32> to vector<2x8xf32>
    %69 = vector.shape_cast %68 : vector<2x8xf32> to vector<2x8x1xf32>
    %70 = vector.broadcast %69 : vector<2x8x1xf32> to vector<2x8x8xf32>
    %71 = arith.subf %67, %70 : vector<2x8x8xf32>
    %72 = math.exp %71 : vector<2x8x8xf32>
    %cst_29 = arith.constant dense<0.000000e+00> : vector<2x8xf32>
    %73 = vector.multi_reduction <add>, %72, %cst_29 [2] : vector<2x8x8xf32> to vector<2x8xf32>
    %74 = vector.shape_cast %73 : vector<2x8xf32> to vector<2x8x1xf32>
    %75 = tpu.reciprocal %74 {approx = true} : vector<2x8x1xf32> -> vector<2x8x1xf32>
    %76 = vector.broadcast %75 : vector<2x8x1xf32> to vector<2x8x8xf32>
    %77 = arith.mulf %72, %76 : vector<2x8x8xf32>
    "tpu.trace_start"() <{level = 10 : i32, message = "bqk,bkd->bqd"}> : () -> ()
    %cst_30 = arith.constant dense<0.000000e+00> : vector<2x8x32xf32>
    %78 = tpu.matmul %77, %66, %cst_30 {dimension_numbers = #tpu.dot_dimension_numbers<[2], [1], [1], [2], [0, 0, 0, 1, 1, 2], [0], [0]>} : vector<2x8x8xf32>, vector<2x8x32xf32>, vector<2x8x32xf32> -> vector<2x8x32xf32>
    "tpu.trace_stop"() : () -> ()
    %79 = vector.shape_cast %78 : vector<2x8x32xf32> to vector<16x32xf32>
    %c0_31 = arith.constant 0 : index
    %c64 = arith.constant 64 : index
    %c0_32 = arith.constant 0 : index
    %80 = vector.load %arg10[%c0_31, %c64, %c0_32] : memref<1x128x128xf32, #tpu.memory_space<vmem>>, vector<1x32x128xf32>
    %81 = vector.shape_cast %80 : vector<1x32x128xf32> to vector<32x128xf32>
    %cst_33 = arith.constant dense<0.000000e+00> : vector<16x128xf32>
    %82 = tpu.matmul %79, %81, %cst_33 {dimension_numbers = #tpu.dot_dimension_numbers<[1], [0], [0], [1], [0, 0, 1, 1], [], []>} : vector<16x32xf32>, vector<32x128xf32>, vector<16x128xf32> -> vector<16x128xf32>
    %83 = arith.addf %61, %82 : vector<16x128xf32>
    %84 = vector.extract_strided_slice %12 {offsets = [0, 0, 96], sizes = [2, 8, 32], strides = [1, 1, 1]} : vector<2x8x128xf32> to vector<2x8x32xf32>
    %cst_34 = arith.constant 0.176776692 : f32
    %85 = vector.broadcast %cst_34 : f32 to vector<2x8x32xf32>
    %86 = arith.mulf %84, %85 : vector<2x8x32xf32>
    %87 = vector.extract_strided_slice %14 {offsets = [0, 0, 96], sizes = [2, 8, 32], strides = [1, 1, 1]} : vector<2x8x128xf32> to vector<2x8x32xf32>
    %88 = vector.extract_strided_slice %16 {offsets = [0, 0, 96], sizes = [2, 8, 32], strides = [1, 1, 1]} : vector<2x8x128xf32> to vector<2x8x32xf32>
    "tpu.trace_start"() <{level = 10 : i32, message = "bqd,bkd->bqk"}> : () -> ()
    %cst_35 = arith.constant dense<0.000000e+00> : vector<2x8x8xf32>
    %89 = tpu.matmul %86, %87, %cst_35 {dimension_numbers = #tpu.dot_dimension_numbers<[2], [2], [1], [1], [0, 0, 0, 1, 1, 1], [0], [0]>} : vector<2x8x32xf32>, vector<2x8x32xf32>, vector<2x8x8xf32> -> vector<2x8x8xf32>
    "tpu.trace_stop"() : () -> ()
    %cst_36 = arith.constant dense<0xFF800000> : vector<2x8xf32>
    %90 = vector.multi_reduction <maximumf>, %89, %cst_36 [2] : vector<2x8x8xf32> to vector<2x8xf32>
    %91 = vector.shape_cast %90 : vector<2x8xf32> to vector<2x8x1xf32>
    %92 = vector.broadcast %91 : vector<2x8x1xf32> to vector<2x8x8xf32>
    %93 = arith.subf %89, %92 : vector<2x8x8xf32>
    %94 = math.exp %93 : vector<2x8x8xf32>
    %cst_37 = arith.constant dense<0.000000e+00> : vector<2x8xf32>
    %95 = vector.multi_reduction <add>, %94, %cst_37 [2] : vector<2x8x8xf32> to vector<2x8xf32>
    %96 = vector.shape_cast %95 : vector<2x8xf32> to vector<2x8x1xf32>
    %97 = tpu.reciprocal %96 {approx = true} : vector<2x8x1xf32> -> vector<2x8x1xf32>
    %98 = vector.broadcast %97 : vector<2x8x1xf32> to vector<2x8x8xf32>
    %99 = arith.mulf %94, %98 : vector<2x8x8xf32>
    "tpu.trace_start"() <{level = 10 : i32, message = "bqk,bkd->bqd"}> : () -> ()
    %cst_38 = arith.constant dense<0.000000e+00> : vector<2x8x32xf32>
    %100 = tpu.matmul %99, %88, %cst_38 {dimension_numbers = #tpu.dot_dimension_numbers<[2], [1], [1], [2], [0, 0, 0, 1, 1, 2], [0], [0]>} : vector<2x8x8xf32>, vector<2x8x32xf32>, vector<2x8x32xf32> -> vector<2x8x32xf32>
    "tpu.trace_stop"() : () -> ()
    %101 = vector.shape_cast %100 : vector<2x8x32xf32> to vector<16x32xf32>
    %c0_39 = arith.constant 0 : index
    %c96 = arith.constant 96 : index
    %c0_40 = arith.constant 0 : index
    %102 = vector.load %arg10[%c0_39, %c96, %c0_40] : memref<1x128x128xf32, #tpu.memory_space<vmem>>, vector<1x32x128xf32>
    %103 = vector.shape_cast %102 : vector<1x32x128xf32> to vector<32x128xf32>
    %cst_41 = arith.constant dense<0.000000e+00> : vector<16x128xf32>
    %104 = tpu.matmul %101, %103, %cst_41 {dimension_numbers = #tpu.dot_dimension_numbers<[1], [0], [0], [1], [0, 0, 1, 1], [], []>} : vector<16x32xf32>, vector<32x128xf32>, vector<16x128xf32> -> vector<16x128xf32>
    %105 = arith.addf %83, %104 : vector<16x128xf32>
    %c0_42 = arith.constant 0 : index
    %c0_43 = arith.constant 0 : index
    %c0_44 = arith.constant 0 : index
    %106 = vector.load %arg11[%c0_42, %c0_43, %c0_44] : memref<1x1x128xf32, #tpu.memory_space<vmem>>, vector<1x1x128xf32>
    %107 = vector.shape_cast %106 : vector<1x1x128xf32> to vector<1x128xf32>
    %108 = vector.broadcast %107 : vector<1x128xf32> to vector<16x128xf32>
    %109 = arith.addf %105, %108 : vector<16x128xf32>
    %110 = arith.addf %3, %109 : vector<16x128xf32>
    %c0_45 = arith.constant 0 : index
    %c0_46 = arith.constant 0 : index
    %c0_47 = arith.constant 0 : index
    %111 = vector.load %arg12[%c0_45, %c0_46, %c0_47] : memref<1x1x128xf32, #tpu.memory_space<vmem>>, vector<1x1x128xf32>
    %112 = vector.shape_cast %111 : vector<1x1x128xf32> to vector<1x128xf32>
    %c0_48 = arith.constant 0 : index
    %c0_49 = arith.constant 0 : index
    %c0_50 = arith.constant 0 : index
    %113 = vector.load %arg13[%c0_48, %c0_49, %c0_50] : memref<1x1x128xf32, #tpu.memory_space<vmem>>, vector<1x1x128xf32>
    %114 = vector.shape_cast %113 : vector<1x1x128xf32> to vector<1x128xf32>
    %cst_51 = arith.constant dense<0.000000e+00> : vector<16xf32>
    %115 = vector.multi_reduction <add>, %110, %cst_51 [1] : vector<16x128xf32> to vector<16xf32>
    %116 = vector.shape_cast %115 : vector<16xf32> to vector<16x1xf32>
    %cst_52 = arith.constant 1.280000e+02 : f32
    %117 = vector.broadcast %cst_52 : f32 to vector<16x1xf32>
    %118 = arith.divf %116, %117 : vector<16x1xf32>
    %119 = vector.broadcast %118 : vector<16x1xf32> to vector<16x128xf32>
    %120 = arith.subf %110, %119 : vector<16x128xf32>
    %121 = arith.mulf %120, %120 : vector<16x128xf32>
    %cst_53 = arith.constant dense<0.000000e+00> : vector<16xf32>
    %122 = vector.multi_reduction <add>, %121, %cst_53 [1] : vector<16x128xf32> to vector<16xf32>
    %123 = vector.shape_cast %122 : vector<16xf32> to vector<16x1xf32>
    %cst_54 = arith.constant 1.280000e+02 : f32
    %124 = vector.broadcast %cst_54 : f32 to vector<16x1xf32>
    %125 = arith.divf %123, %124 : vector<16x1xf32>
    %126 = vector.broadcast %118 : vector<16x1xf32> to vector<16x128xf32>
    %127 = arith.subf %110, %126 : vector<16x128xf32>
    %cst_55 = arith.constant 9.99999974E-6 : f32
    %128 = vector.broadcast %cst_55 : f32 to vector<16x1xf32>
    %129 = arith.addf %125, %128 : vector<16x1xf32>
    %130 = math.rsqrt %129 : vector<16x1xf32>
    %131 = vector.broadcast %130 : vector<16x1xf32> to vector<16x128xf32>
    %132 = arith.mulf %127, %131 : vector<16x128xf32>
    %133 = vector.broadcast %112 : vector<1x128xf32> to vector<16x128xf32>
    %134 = arith.mulf %132, %133 : vector<16x128xf32>
    %135 = vector.broadcast %114 : vector<1x128xf32> to vector<16x128xf32>
    %136 = arith.addf %134, %135 : vector<16x128xf32>
    %c0_56 = arith.constant 0 : index
    %c0_57 = arith.constant 0 : index
    %c0_58 = arith.constant 0 : index
    %137 = vector.load %arg14[%c0_56, %c0_57, %c0_58] : memref<1x128x128xf32, #tpu.memory_space<vmem>>, vector<1x128x128xf32>
    %138 = vector.shape_cast %137 : vector<1x128x128xf32> to vector<128x128xf32>
    %cst_59 = arith.constant dense<0.000000e+00> : vector<16x128xf32>
    %139 = tpu.matmul %136, %138, %cst_59 {dimension_numbers = #tpu.dot_dimension_numbers<[1], [0], [0], [1], [0, 0, 1, 1], [], []>} : vector<16x128xf32>, vector<128x128xf32>, vector<16x128xf32> -> vector<16x128xf32>
    %c0_60 = arith.constant 0 : index
    %c0_61 = arith.constant 0 : index
    %c0_62 = arith.constant 0 : index
    %140 = vector.load %arg15[%c0_60, %c0_61, %c0_62] : memref<1x1x128xf32, #tpu.memory_space<vmem>>, vector<1x1x128xf32>
    %141 = vector.shape_cast %140 : vector<1x1x128xf32> to vector<1x128xf32>
    %142 = vector.broadcast %141 : vector<1x128xf32> to vector<16x128xf32>
    %143 = arith.addf %139, %142 : vector<16x128xf32>
    %cst_63 = arith.constant 0.000000e+00 : f32
    %144 = vector.broadcast %cst_63 : f32 to vector<16x128xf32>
    %145 = arith.maximumf %143, %144 : vector<16x128xf32>
    %c0_64 = arith.constant 0 : index
    %c0_65 = arith.constant 0 : index
    %c0_66 = arith.constant 0 : index
    %146 = vector.load %arg16[%c0_64, %c0_65, %c0_66] : memref<1x128x128xf32, #tpu.memory_space<vmem>>, vector<1x128x128xf32>
    %147 = vector.shape_cast %146 : vector<1x128x128xf32> to vector<128x128xf32>
    %cst_67 = arith.constant dense<0.000000e+00> : vector<16x128xf32>
    %148 = tpu.matmul %145, %147, %cst_67 {dimension_numbers = #tpu.dot_dimension_numbers<[1], [0], [0], [1], [0, 0, 1, 1], [], []>} : vector<16x128xf32>, vector<128x128xf32>, vector<16x128xf32> -> vector<16x128xf32>
    %c0_68 = arith.constant 0 : index
    %c0_69 = arith.constant 0 : index
    %c0_70 = arith.constant 0 : index
    %149 = vector.load %arg17[%c0_68, %c0_69, %c0_70] : memref<1x1x128xf32, #tpu.memory_space<vmem>>, vector<1x1x128xf32>
    %150 = vector.shape_cast %149 : vector<1x1x128xf32> to vector<1x128xf32>
    %151 = vector.broadcast %150 : vector<1x128xf32> to vector<16x128xf32>
    %152 = arith.addf %148, %151 : vector<16x128xf32>
    %153 = arith.addf %136, %152 : vector<16x128xf32>
    %c0_71 = arith.constant 0 : index
    %c0_72 = arith.constant 0 : index
    %c0_73 = arith.constant 0 : index
    %154 = vector.load %arg18[%c0_71, %c0_72, %c0_73] : memref<1x1x128xf32, #tpu.memory_space<vmem>>, vector<1x1x128xf32>
    %155 = vector.shape_cast %154 : vector<1x1x128xf32> to vector<1x128xf32>
    %c0_74 = arith.constant 0 : index
    %c0_75 = arith.constant 0 : index
    %c0_76 = arith.constant 0 : index
    %156 = vector.load %arg19[%c0_74, %c0_75, %c0_76] : memref<1x1x128xf32, #tpu.memory_space<vmem>>, vector<1x1x128xf32>
    %157 = vector.shape_cast %156 : vector<1x1x128xf32> to vector<1x128xf32>
    %cst_77 = arith.constant dense<0.000000e+00> : vector<16xf32>
    %158 = vector.multi_reduction <add>, %153, %cst_77 [1] : vector<16x128xf32> to vector<16xf32>
    %159 = vector.shape_cast %158 : vector<16xf32> to vector<16x1xf32>
    %cst_78 = arith.constant 1.280000e+02 : f32
    %160 = vector.broadcast %cst_78 : f32 to vector<16x1xf32>
    %161 = arith.divf %159, %160 : vector<16x1xf32>
    %162 = vector.broadcast %161 : vector<16x1xf32> to vector<16x128xf32>
    %163 = arith.subf %153, %162 : vector<16x128xf32>
    %164 = arith.mulf %163, %163 : vector<16x128xf32>
    %cst_79 = arith.constant dense<0.000000e+00> : vector<16xf32>
    %165 = vector.multi_reduction <add>, %164, %cst_79 [1] : vector<16x128xf32> to vector<16xf32>
    %166 = vector.shape_cast %165 : vector<16xf32> to vector<16x1xf32>
    %cst_80 = arith.constant 1.280000e+02 : f32
    %167 = vector.broadcast %cst_80 : f32 to vector<16x1xf32>
    %168 = arith.divf %166, %167 : vector<16x1xf32>
    %169 = vector.broadcast %161 : vector<16x1xf32> to vector<16x128xf32>
    %170 = arith.subf %153, %169 : vector<16x128xf32>
    %cst_81 = arith.constant 9.99999974E-6 : f32
    %171 = vector.broadcast %cst_81 : f32 to vector<16x1xf32>
    %172 = arith.addf %168, %171 : vector<16x1xf32>
    %173 = math.rsqrt %172 : vector<16x1xf32>
    %174 = vector.broadcast %173 : vector<16x1xf32> to vector<16x128xf32>
    %175 = arith.mulf %170, %174 : vector<16x128xf32>
    %176 = vector.broadcast %155 : vector<1x128xf32> to vector<16x128xf32>
    %177 = arith.mulf %175, %176 : vector<16x128xf32>
    %178 = vector.broadcast %157 : vector<1x128xf32> to vector<16x128xf32>
    %179 = arith.addf %177, %178 : vector<16x128xf32>
    %c0_82 = arith.constant 0 : index
    %c0_83 = arith.constant 0 : index
    %180 = vector.load %arg20[%c0_82, %c0_83] : memref<16x128xf32, #tpu.memory_space<vmem>>, vector<16x128xf32>
    tpu.vector_store %arg20[%c0_82, %c0_83], %179 {strides = array<i32>} : memref<16x128xf32, #tpu.memory_space<vmem>>, vector<16x128xf32>,
    return
  }
  func.func @transform_0(%arg0: i32) -> (i32, i32) {
    %c0_i32 = arith.constant 0 : i32
    %c0_i32_0 = arith.constant 0 : i32
    %c0_i32_1 = arith.constant 0 : i32
    return %c0_i32, %c0_i32_0 : i32, i32
  }
  func.func @transform_1(%arg0: i32) -> (i32, i32) {
    %c0_i32 = arith.constant 0 : i32
    %c0_i32_0 = arith.constant 0 : i32
    %c0_i32_1 = arith.constant 0 : i32
    return %c0_i32, %c0_i32_0 : i32, i32
  }
  func.func @transform_2(%arg0: i32) -> (i32, i32) {
    %c0_i32 = arith.constant 0 : i32
    %c0_i32_0 = arith.constant 0 : i32
    %c0_i32_1 = arith.constant 0 : i32
    return %c0_i32, %c0_i32_0 : i32, i32
  }
  func.func @transform_3(%arg0: i32) -> (i32, i32) {
    %c0_i32 = arith.constant 0 : i32
    %c0_i32_0 = arith.constant 0 : i32
    %c0_i32_1 = arith.constant 0 : i32
    return %c0_i32, %c0_i32_0 : i32, i32
  }
  func.func @transform_4(%arg0: i32) -> (i32, i32) {
    %c0_i32 = arith.constant 0 : i32
    %c0_i32_0 = arith.constant 0 : i32
    %c0_i32_1 = arith.constant 0 : i32
    return %c0_i32, %c0_i32_0 : i32, i32
  }
  func.func @transform_5(%arg0: i32) -> (i32, i32) {
    %c0_i32 = arith.constant 0 : i32
    %c0_i32_0 = arith.constant 0 : i32
    %c0_i32_1 = arith.constant 0 : i32
    return %c0_i32, %c0_i32_0 : i32, i32
  }
  func.func @transform_6(%arg0: i32) -> (i32, i32) {
    %c0_i32 = arith.constant 0 : i32
    %c0_i32_0 = arith.constant 0 : i32
    %c0_i32_1 = arith.constant 0 : i32
    return %c0_i32, %c0_i32_0 : i32, i32
  }
  func.func @transform_7(%arg0: i32) -> (i32, i32, i32) {
    %c0_i32 = arith.constant 0 : i32
    %c0_i32_0 = arith.constant 0 : i32
    %c0_i32_1 = arith.constant 0 : i32
    return %arg0, %c0_i32, %c0_i32_0 : i32, i32, i32
  }
  func.func @transform_8(%arg0: i32) -> (i32, i32, i32) {
    %c0_i32 = arith.constant 0 : i32
    %c0_i32_0 = arith.constant 0 : i32
    %c0_i32_1 = arith.constant 0 : i32
    return %arg0, %c0_i32, %c0_i32_0 : i32, i32, i32
  }
  func.func @transform_9(%arg0: i32) -> (i32, i32, i32) {
    %c0_i32 = arith.constant 0 : i32
    %c0_i32_0 = arith.constant 0 : i32
    %c0_i32_1 = arith.constant 0 : i32
    return %arg0, %c0_i32, %c0_i32_0 : i32, i32, i32
  }
  func.func @transform_10(%arg0: i32) -> (i32, i32, i32) {
    %c0_i32 = arith.constant 0 : i32
    %c0_i32_0 = arith.constant 0 : i32
    %c0_i32_1 = arith.constant 0 : i32
    return %arg0, %c0_i32, %c0_i32_0 : i32, i32, i32
  }
  func.func @transform_11(%arg0: i32) -> (i32, i32, i32) {
    %c0_i32 = arith.constant 0 : i32
    %c0_i32_0 = arith.constant 0 : i32
    %c0_i32_1 = arith.constant 0 : i32
    return %arg0, %c0_i32, %c0_i32_0 : i32, i32, i32
  }
  func.func @transform_12(%arg0: i32) -> (i32, i32, i32) {
    %c0_i32 = arith.constant 0 : i32
    %c0_i32_0 = arith.constant 0 : i32
    %c0_i32_1 = arith.constant 0 : i32
    return %arg0, %c0_i32, %c0_i32_0 : i32, i32, i32
  }
  func.func @transform_13(%arg0: i32) -> (i32, i32, i32) {
    %c0_i32 = arith.constant 0 : i32
    %c0_i32_0 = arith.constant 0 : i32
    %c0_i32_1 = arith.constant 0 : i32
    return %arg0, %c0_i32, %c0_i32_0 : i32, i32, i32
  }
  func.func @transform_14(%arg0: i32) -> (i32, i32, i32) {
    %c0_i32 = arith.constant 0 : i32
    %c0_i32_0 = arith.constant 0 : i32
    %c0_i32_1 = arith.constant 0 : i32
    return %arg0, %c0_i32, %c0_i32_0 : i32, i32, i32
  }
  func.func @transform_15(%arg0: i32) -> (i32, i32, i32) {
    %c0_i32 = arith.constant 0 : i32
    %c0_i32_0 = arith.constant 0 : i32
    %c0_i32_1 = arith.constant 0 : i32
    return %arg0, %c0_i32, %c0_i32_0 : i32, i32, i32
  }
  func.func @transform_16(%arg0: i32) -> (i32, i32, i32) {
    %c0_i32 = arith.constant 0 : i32
    %c0_i32_0 = arith.constant 0 : i32
    %c0_i32_1 = arith.constant 0 : i32
    return %arg0, %c0_i32, %c0_i32_0 : i32, i32, i32
  }
  func.func @transform_17(%arg0: i32) -> (i32, i32, i32) {
    %c0_i32 = arith.constant 0 : i32
    %c0_i32_0 = arith.constant 0 : i32
    %c0_i32_1 = arith.constant 0 : i32
    return %arg0, %c0_i32, %c0_i32_0 : i32, i32, i32
  }
  func.func @transform_18(%arg0: i32) -> (i32, i32, i32) {
    %c0_i32 = arith.constant 0 : i32
    %c0_i32_0 = arith.constant 0 : i32
    %c0_i32_1 = arith.constant 0 : i32
    return %arg0, %c0_i32, %c0_i32_0 : i32, i32, i32
  }
  func.func @transform_19(%arg0: i32) -> (i32, i32) {
    %c0_i32 = arith.constant 0 : i32
    %c0_i32_0 = arith.constant 0 : i32
    %c0_i32_1 = arith.constant 0 : i32
    return %c0_i32, %c0_i32_0 : i32, i32
  }
}

</mosaic_0001>

<bundles_post_ra>
// kernel: micro_scgpt_forward.1
= control target key start
LH: loop header
LB: loop body
LE: loop exit
PB: predicated region body
PF: predicated region fallthrough
CT: control target
= control target key end

     0   :  { %s5121_s0 = inlined_call_operand.vmem [shape: s32[16,1], index: 0, kind: input, shape index: {}]   ;;  %s5122_s1 = inlined_call_operand.vmem [shape: s32[16,1], index: 1, kind: input, shape index: {}]   ;;  %s5123_s2 = inlined_call_operand.hbm [shape: f32[50,128], index: 2, kind: input, shape index: {}]   ;;  %s5124_s3 = inlined_call_operand.vmem [shape: f32[1,128], index: 3, kind: input, shape index: {}]   ;;  %s5125_s4 = inlined_call_operand.vmem [shape: f32[1,128], index: 4, kind: input, shape index: {}]   ;;  %s5126_s5 = inlined_call_operand.vmem [shape: f32[1,128], index: 5, kind: input, shape index: {}]   ;;  %s5127_s6 = inlined_call_operand.vmem [shape: f32[1,128], index: 6, kind: input, shape index: {}]   ;;  %s5128_s7 = inlined_call_operand.hbm [shape: f32[4,128,384], index: 7, kind: input, shape index: {}]   ;;  %s5129_s8 = inlined_call_operand.vmem [shape: f32[4,1,384], index: 8, kind: input, shape index: {}]   ;;  %s5130_s9 = inlined_call_operand.hbm [shape: f32[4,128,128], index: 9, kind: input, shape index: {}]   ;;  %s5131_s10 = inlined_call_operand.vmem [shape: f32[4,1,128], index: 10, kind: input, shape index: {}]   ;;  %s5132_s11 = inlined_call_operand.vmem [shape: f32[4,1,128], index: 11, kind: input, shape index: {}]   ;;  %s5133_s12 = inlined_call_operand.vmem [shape: f32[4,1,128], index: 12, kind: input, shape index: {}]   ;;  %s5134_s13 = inlined_call_operand.hbm [shape: f32[4,128,128], index: 13, kind: input, shape index: {}]   ;;  %s5135_s14 = inlined_call_operand.vmem [shape: f32[4,1,128], index: 14, kind: input, shape index: {}]   ;;  %s5136_s15 = inlined_call_operand.hbm [shape: f32[4,128,128], index: 15, kind: input, shape index: {}]   ;;  %s5137_s16 = inlined_call_operand.vmem [shape: f32[4,1,128], index: 16, kind: input, shape index: {}]   ;;  %s5138_s17 = inlined_call_operand.vmem [shape: f32[4,1,128], index: 17, kind: input, shape index: {}]   ;;  %s5139_s18 = inlined_call_operand.vmem [shape: f32[4,1,128], index: 18, kind: input, shape index: {}]   ;;  %s5140_s19 = inlined_call_operand.hbm [shape: f32[16,128], index: 19, kind: output, shape index: {}]  }
   0x1   :  { %5157 = sst [smem:[#allocation20_spill]] %s5121_s0 }
   0x2   :  { %5158 = sst [smem:[#allocation21_spill]] %s5122_s1 }
   0x3   :  { %5159 = sst [smem:[#allocation22_spill]] %s5123_s2 }
   0x4   :  { %5160 = sst [smem:[#allocation23_spill]] %s5124_s3 }
   0x5   :  { %5161 = sst [smem:[#allocation24_spill]] %s5125_s4 }
   0x6   :  { %5162 = sst [smem:[#allocation25_spill]] %s5126_s5 }
   0x7   :  { %5163 = sst [smem:[#allocation26_spill]] %s5127_s6 }
   0x8   :  { %5164 = sst [smem:[#allocation27_spill]] %s5128_s7 }
   0x9   :  { %5165 = sst [smem:[#allocation28_spill]] %s5130_s9 }
   0xa   :  { %5166 = sst [smem:[#allocation29_spill]] %s5134_s13 }
   0xb   :  { %5167 = sst [smem:[#allocation30_spill]] %s5136_s15 }
   0xc   :  { %5168 = sst [smem:[#allocation31_spill]] %s5137_s16 }
   0xd   :  { %5169 = sst [smem:[#allocation32_spill]] %s5138_s17 }
   0xe   :  { %5170 = sst [smem:[#allocation33_spill]] %s5139_s18 }
   0xf   :  { %5171 = sst [smem:[#allocation34_spill]] %s5140_s19 }
  0x10   :  { %24 = vsyncpa [#allocation3], 0 }
  0x11   :  { %25 = vsyncpa [#allocation6], 0 }
  0x12   :  { %27 = vsyncpa [#allocation6 + $0x1], 0 }
  0x13   :  { %28 = vsyncpa [#allocation9], 0 }
  0x14   :  { %30 = vsyncpa [#allocation9 + $0x1], 0 }
  0x15   :  { %31 = vsyncpa [#allocation4], 0  ;;  %s4467_s0 = smov 0   ;;  %s4469_s30 = smov 0  }
  0x16   :  { %s4471_s20 = smov 0   ;;  %s4473_s21 = smov 0  }
  0x17 LB: > { %5172 = sst [smem:[#allocation16_spill]] %s4338_s30  ;;  %s4488_s1 = sadd.s32 1, %s4346_s21   ;;  %s4346_s21 = sphi %s4473_s21, %s5212_s21   ;;  %s4342_s20 = sphi %s4471_s20, %s5215_s20   ;;  %s4338_s30 = sphi %s4469_s30, %s5214_s30   ;;  %s4334_s0 = sphi %s4467_s0, %s5213_s0  }
  0x18   : > { %5173 = sst [smem:[#allocation17_spill]] %s4342_s20  ;;  %s191_s22 = sadd.s32 1, %s4342_s20 }
  0x19   : > { %5174 = sst [smem:[#allocation18_spill]] %s4488_s1  ;;  %s188_s2 = ssub.s32 %s4346_s21, %s4488_s1 }
  0x1a   : > { %p198_p0 = scmp.ne.s32.totalorder %s4342_s20, %s4338_s30  ;;  %p189_p1 = scmp.eq.s32.totalorder %s188_s2, 0 }
  0x1b   : > { %p199_p2 = scmp.eq.s32.totalorder %s4346_s21, 0  ;;  %p4037_p3 = scmp.lt.s32.totalorder %s4346_s21, 4 }
  0x1c   : > { %s4498_s23 = scalar_select %p189_p1, %s4342_s20, %s191_s22  }
  0x1d   : > { %p200_p4 = por %p199_p2, %p198_p0  ;;  %s5146_s24 = sand.u32 1, %s4346_s21  }
  0x1e   : > { %5175 = sst [smem:[#allocation19_spill]] %s4498_s23  ;;  %s5145_s25 = sand.u32 1, %s4342_s20  }
  0x1f   : > { %s3999_s3 = smul.u32 384, %s5145_s25  ;;  %p4504_p5 = pnand %p4037_p3, %p200_p4 }
  0x20   : > { %s4000_s27 = smul.u32 6144, %s4346_s21  ;;  %s5177_s7 = sld [smem:[#allocation27_spill]] }
  0x21   : > { %s570_s22 = scalar_lea.vmem [#allocation5], %s3999_s3  ;;  %s4518_s25 = scalar_lea.sflag [#allocation6], %s5146_s24 }
  0x22   : > { %s577_s2 = sshll.u32 %s570_s22, 4  ;;  %p4524_p7 = pneg %p4504_p5  ;;  %s4514_s2 = int_to_ptr.vmem [resolvable:$true] %s577_s2 }
  0x26   : > { %s4512_s1 = scalar_lea.hbm %s5177_s7, %s4000_s27  ;;  %s4143_s3 = scalar_lea.hbm %s5177_s7, 24576 }
  0x27   : > { %s4138_s23 = scalar_lea.hbm %s4512_s1, 6144  ;;  %p4144_p10 = scmp.lt.s32.totalorder %s4512_s1, %s5177_s7 }
  0x28   : > { %p4139_p6 = scmp.ne.s32.totalorder %s4512_s1, %s4138_s23  ;;  %p4145_p11 = scmp.lt.s32.totalorder %s4143_s3, %s4138_s23 }
  0x2a   : > { %p4141_p8 = pnand %p4524_p7, %p4139_p6  ;;  %p4146_p12 = por %p4145_p11, %p4144_p10 }
  0x2c   : > { %p4142_p9 = pneg %p4141_p8 }
  0x2e   : > { %p4147_p13 = pnand %p4146_p12, %p4142_p9 }
  0x30   : > { %4150 = shalt.err (!%p4147_p13)
}
  0x31   : > { %s4151_s24 = scalar_lea.vmem %s4514_s2, 6144  ;;  %s4348_s4 = smov [#allocation5]  }
  0x32   : > { %p4152_p0 = scmp.ne.s32.totalorder %s4514_s2, %s4151_s24  ;;  %s4156_s27 = sshll.u32 %s4348_s4, 4  ;;  %s4157_s27 = int_to_ptr.vmem [resolvable:$false] %s4156_s27 }
  0x33   : > { %s4158_s28 = scalar_lea.vmem %s4157_s27, 12288  ;;  %p4159_p3 = scmp.lt.s32.totalorder %s4514_s2, %s4157_s27 }
  0x34   : > { %p4154_p1 = pnand %p4152_p0, %p4524_p7  ;;  %p4160_p4 = scmp.lt.s32.totalorder %s4158_s28, %s4151_s24 }
  0x36   : > { %p4155_p2 = pneg %p4154_p1  ;;  %p4161_p6 = por %p4160_p4, %p4159_p3 }
  0x38   : > { %p4162_p8 = pnand %p4161_p6, %p4155_p2 }
  0x3a   : > { %4165 = shalt.err (!%p4162_p8)
}
  0x3b   : > { %s4349_s23 = smov 384   ;;  %s4350_s3 = smov 24  }
  0x3c   : > { %4026 = dma.hbm_to_vmem [thread:$0]  (!%p4504_p5), %s4512_s1, 6144, %s4514_s2, %s4518_s25, %s4349_s23, %s4349_s23, %s4350_s3  }
  0x3d   : > { %s5179_s4 = sand.u32 1, %s4342_s20   ;;  %s4552_s24 = sshll.u32 %s4346_s21, 11 }
  0x3e   : > { %s4549_s29 = sshll.u32 %s5179_s4, 7  ;;  %s5180_s13 = sld [smem:[#allocation29_spill]] }
  0x3f   : > { %s637_s7 = scalar_lea.vmem [#allocation8], %s4549_s29  ;;  %s5181_s1 = sand.u32 1, %s4346_s21  }
  0x40   : > { %s644_s6 = sshll.u32 %s637_s7, 4  ;;  %s4565_s2 = scalar_lea.sflag [#allocation9], %s5181_s1  ;;  %s4561_s6 = int_to_ptr.vmem [resolvable:$true] %s644_s6 }
  0x44   : > { %s4558_s28 = scalar_lea.hbm %s5180_s13, %s4552_s24  ;;  %s4171_s22 = scalar_lea.hbm %s5180_s13, 8192 }
  0x45   : > { %s4166_s23 = scalar_lea.hbm %s4558_s28, 2048  ;;  %p4172_p12 = scmp.lt.s32.totalorder %s4558_s28, %s5180_s13 }
  0x46   : > { %p4167_p9 = scmp.ne.s32.totalorder %s4558_s28, %s4166_s23  ;;  %p4173_p13 = scmp.lt.s32.totalorder %s4171_s22, %s4166_s23 }
  0x48   : > { %p4169_p10 = pnand %p4167_p9, %p4524_p7  ;;  %p4174_p0 = por %p4173_p13, %p4172_p12 }
  0x4a   : > { %p4170_p11 = pneg %p4169_p10 }
  0x4c   : > { %p4175_p1 = pnand %p4174_p0, %p4170_p11 }
  0x4e   : > { %4178 = shalt.err (!%p4175_p1)
}
  0x4f   : > { %s4179_s7 = scalar_lea.vmem %s4561_s6, 2048  ;;  %s4351_s1 = smov [#allocation8]  }
  0x50   : > { %p4180_p2 = scmp.ne.s32.totalorder %s4561_s6, %s4179_s7  ;;  %s4184_s3 = sshll.u32 %s4351_s1, 4  ;;  %s4185_s3 = int_to_ptr.vmem [resolvable:$false] %s4184_s3 }
  0x51   : > { %s4186_s4 = scalar_lea.vmem %s4185_s3, 4096  ;;  %p4187_p6 = scmp.lt.s32.totalorder %s4561_s6, %s4185_s3 }
  0x52   : > { %p4182_p3 = pnand %p4180_p2, %p4524_p7  ;;  %p4188_p8 = scmp.lt.s32.totalorder %s4186_s4, %s4179_s7 }
  0x54   : > { %p4183_p4 = pneg %p4182_p3  ;;  %p4189_p9 = por %p4188_p8, %p4187_p6 }
  0x56   : > { %p4190_p10 = pnand %p4189_p9, %p4183_p4 }
  0x58   : > { %4193 = shalt.err (!%p4190_p10)
}
  0x59   : > { %s5148_s20 = smov 128   ;;  %s5150_s23 = smov 8  }
  0x5a   : > { %4032 = dma.hbm_to_vmem [thread:$0]  (!%p4504_p5), %s4558_s28, 2048, %s4561_s6, %s4565_s2, %s5148_s20, %s5148_s20, %s5150_s23  }
  0x5b   : > { %s4592_s22 = sadd.s32 4294967295, %s4346_s21   ;;  %p204_p11 = scmp.ne.s32.totalorder %s4338_s30, %s4334_s0 }
  0x5c   : > { %p5152_p12 = scmp.eq.s32.totalorder %s4592_s22, 0  ;;  %p3529_p13 = scmp.ge.s32.totalorder %s4346_s21, 1 }
  0x5d   : > { %p522_p0 = scmp.lt.s32.totalorder %s4346_s21, 5  ;;  %s4354_s6 = smov [#allocation2]  }
  0x5e   : > { %p4601_p1 = por %p5152_p12, %p204_p11  ;;  %s540_s28 = sshll.u32 %s4354_s6, 4  ;;  %s4612_s28 = int_to_ptr.vmem [resolvable:$true] %s540_s28 }
  0x5f   : > { %p4606_p3 = pnand %p3529_p13, %p522_p0  ;;  %s5184_s9 = sld [smem:[#allocation28_spill]] }
  0x60   : > { %s5182_s27 = scalar_select %p4601_p1, 1, 0 }
  0x61   : > { %s5183_s7 = scalar_select %p4606_p3, 1, 0 }
  0x62   : > { %p4019_p4 = pneg %p4606_p3  ;;  %s598_s3 = scalar_lea.vmem [#allocation7], %s4549_s29 }
  0x63   : > { %s605_s4 = sshll.u32 %s598_s3, 4  ;;  %s606_s4 = int_to_ptr.vmem [resolvable:$true] %s605_s4 }
  0x64   : > { %p4623_p6 = pnand %p4019_p4, %p5152_p12 }
  0x65   : > { %s4618_s21 = scalar_lea.hbm %s5184_s9, %s4552_s24  ;;  %s4199_s1 = scalar_lea.hbm %s5184_s9, 8192 }
  0x66   : > { %s5185_s20 = scalar_select %p4623_p6, 1, 0 }
  0x67   : > { %s4194_s6 = scalar_lea.hbm %s4618_s21, 2048  ;;  %p4200_p11 = scmp.lt.s32.totalorder %s4618_s21, %s5184_s9 }
  0x68   : > { %p4195_p8 = scmp.ne.s32.totalorder %s4618_s21, %s4194_s6  ;;  %p4201_p13 = scmp.lt.s32.totalorder %s4199_s1, %s4194_s6 }
  0x6a   : > { %p4197_p9 = pnand %p4195_p8, %p4524_p7  ;;  %p4202_p0 = por %p4201_p13, %p4200_p11 }
  0x6c   : > { %p4198_p10 = pneg %p4197_p9 }
  0x6e   : > { %p4203_p4 = pnand %p4202_p0, %p4198_p10 }
  0x70   : > { %4206 = shalt.err (!%p4203_p4)
}
  0x71   : > { %s4207_s3 = scalar_lea.vmem %s606_s4, 2048  ;;  %s4355_s18 = smov [#allocation7]  }
  0x72   : > { %p4208_p2 = scmp.ne.s32.totalorder %s606_s4, %s4207_s3  ;;  %s4212_s17 = sshll.u32 %s4355_s18, 4  ;;  %s4213_s17 = int_to_ptr.vmem [resolvable:$false] %s4212_s17 }
  0x73   : > { %s4214_s16 = scalar_lea.vmem %s4213_s17, 4096  ;;  %p4215_p8 = scmp.lt.s32.totalorder %s606_s4, %s4213_s17 }
  0x74   : > { %p4210_p12 = pnand %p4208_p2, %p4524_p7  ;;  %p4216_p9 = scmp.lt.s32.totalorder %s4214_s16, %s4207_s3 }
  0x76   : > { %p4211_p1 = pneg %p4210_p12  ;;  %p4217_p3 = por %p4216_p9, %p4215_p8 }
  0x78   : > { %p4218_p6 = pnand %p4217_p3, %p4211_p1 }
  0x7a   : > { %4221 = shalt.err (!%p4218_p6)
}
  0x7b   : > { %s5186_s5 = smov 8   ;;  %s5187_s13 = smov 128  }
  0x7c   : > { %4029 = dma.hbm_to_vmem [thread:$0]  (!%p4504_p5), %s4618_s21, 2048, %s606_s4, %s4518_s25, %s5187_s13, %s5187_s13, %s5186_s5  }
  0x7d   : > { %p5188_p12 = scmp.ne.s32.totalorder %s5185_s20, 0  ;;  %s4233_s18 = scalar_lea.vmem %s4612_s28, 896 }
  0x7e   : > { %p4234_p10 = scmp.ne.s32.totalorder %s4612_s28, %s4233_s18  ;;  %p4241_p1 = scmp.lt.s32.totalorder %s4612_s28, %s4612_s28 }
  0x7f   : > { %p4224_p2 = pneg %p5188_p12  ;;  %p4242_p3 = scmp.lt.s32.totalorder %s4233_s18, %s4233_s18 }
  0x81   : > { %p4236_p11 = pnand %p4234_p10, %p4224_p2  ;;  %p4243_p6 = por %p4242_p3, %p4241_p1 }
  0x83   : > { %p4237_p13 = pneg %p4236_p11 }
  0x85   : > { %p4244_p0 = pnand %p4243_p6, %p4237_p13 }
  0x87   : > { %4247 = shalt.err (!%p4244_p0)
}
  0x88   : > { %s5189_s25 = sld [smem:[#allocation22_spill]]  ;;  %s664_s20 = scalar_lea.vmem [#allocation10], %s4549_s29 }
  0x89   : > { %s5190_s15 = sld [smem:[#allocation30_spill]]  ;;  %s671_s6 = sshll.u32 %s664_s20, 4  ;;  %s672_s6 = int_to_ptr.vmem [resolvable:$true] %s671_s6 }
  0x8e   : > { %4022 = dma.hbm_to_vmem [thread:$0]  (!%p5188_p12), %s5189_s25, 896, %s4612_s28, [#allocation3], %s5187_s13, %s5187_s13, %s5186_s5  }
  0x8f   : > { %s4666_s4 = scalar_lea.hbm %s5190_s15, %s4552_s24  ;;  %s4253_s28 = scalar_lea.hbm %s5190_s15, 8192 }
  0x90   : > { %s4248_s0 = scalar_lea.hbm %s4666_s4, 2048  ;;  %p4254_p12 = scmp.lt.s32.totalorder %s4666_s4, %s5190_s15 }
  0x91   : > { %p4249_p4 = scmp.ne.s32.totalorder %s4666_s4, %s4248_s0  ;;  %p4255_p2 = scmp.lt.s32.totalorder %s4253_s28, %s4248_s0 }
  0x93   : > { %p4251_p8 = pnand %p4249_p4, %p4524_p7  ;;  %p4256_p10 = por %p4255_p2, %p4254_p12 }
  0x95   : > { %p4252_p9 = pneg %p4251_p8 }
  0x97   : > { %p4257_p11 = pnand %p4256_p10, %p4252_p9 }
  0x99   : > { %4260 = shalt.err (!%p4257_p11)
}
  0x9a   : > { %s4261_s29 = scalar_lea.vmem %s672_s6, 2048  ;;  %s4356_s24 = smov [#allocation10]  }
  0x9b   : > { %p4262_p13 = scmp.ne.s32.totalorder %s672_s6, %s4261_s29  ;;  %s4266_s17 = sshll.u32 %s4356_s24, 4  ;;  %s4267_s17 = int_to_ptr.vmem [resolvable:$false] %s4266_s17 }
  0x9c   : > { %s4268_s25 = scalar_lea.vmem %s4267_s17, 4096  ;;  %p4269_p6 = scmp.lt.s32.totalorder %s672_s6, %s4267_s17 }
  0x9d   : > { %p4264_p1 = pnand %p4262_p13, %p4524_p7  ;;  %p4270_p0 = scmp.lt.s32.totalorder %s4268_s25, %s4261_s29 }
  0x9f   : > { %p4265_p3 = pneg %p4264_p1  ;;  %p4271_p4 = por %p4270_p0, %p4269_p6 }
  0xa1   : > { %p4272_p8 = pnand %p4271_p4, %p4265_p3 }
  0xa3   : > { %4275 = shalt.err (!%p4272_p8)
}
  0xa4   : > { %4035 = dma.hbm_to_vmem [thread:$0]  (!%p4504_p5), %s4666_s4, 2048, %s672_s6, %s4565_s2, %s5187_s13, %s5187_s13, %s5186_s5  }
  0xa5   : > { %p5191_p7 = scmp.ne.s32.totalorder %s5183_s7, 0 }
  0xa6   : > { %p5192_p9 = scmp.eq.s32.totalorder (!%p5191_p7), %s4592_s22, 0 }
  0xa7   : > { %701 = sbr.rel (%p5191_p7) target bundleno = 4538 (0x11ba), region = 96 }
  0xac   : > { %4317 = dma.done.wait (%p5192_p9), [#allocation3], 896   ;;  %p5193_p12 = pmov %p5192_p9 }
  0xad   : > { %s707_s19 = sand.u32 1, %s4592_s22   ;;  %s709_s26 = sand.u32 1, %s4338_s30  }
  0xae   : > { %4319 = vsyncadd (%p5193_p12), [#allocation3], 4294966400  ;;  %s4001_s23 = smul.u32 384, %s709_s26  ;;  %s708_s21 = scalar_lea.sflag [#allocation6], %s707_s19 }
  0xaf   : > { %p5194_p2 = scmp.ne.s32.totalorder %s5182_s27, 0 }
  0xb0   : > { %s4697_s20 = scalar_lea.vmem [#allocation5], %s4001_s23 }
  0xb1   : > { %4321 = dma.done.wait (%p5194_p2), %s708_s21, 8192  }
  0xb2   : > { %4323 = vsyncadd (%p5194_p2), %s708_s21, 4294959104  ;;  %s3544_s2 = sshll.u32 %s709_s26, 7  ;;  %s726_s5 = scalar_lea.sflag [#allocation9], %s707_s19 }
  0xb3   : > { %s4703_s7 = scalar_lea.vmem [#allocation7], %s3544_s2  ;;  %s4705_s13 = scalar_lea.vmem [#allocation8], %s3544_s2 }
  0xb4   : > { %4325 = dma.done.wait (%p5194_p2), %s726_s5, 4096  }
  0xb5   : > { %4327 = vsyncadd (%p5194_p2), %s726_s5, 4294963200  ;;  %p828_p5 = scmp.lt.s32.totalorder %s4592_s22, 3  ;;  %s5195_s1 = sld [smem:[#allocation31_spill]] }
  0xb6   : > { %s5196_s28 = sld [smem:[#allocation32_spill]]  ;;  %s4749_s30 = scalar_lea.vmem [#allocation10], %s3544_s2 }
  0xb7   : > { %s4713_s4 = scalar_select %p828_p5, %s4592_s22, 3 }
  0xb8   : > { %s5197_s29 = sld [smem:[#allocation33_spill]]  ;;  %p5198_p10 = scmp.ne.s32.totalorder %s4592_s22, 0 }
  0xb9   : > { %s4002_s6 = smul.u32 3, %s4713_s4  ;;  %s843_s21 = scalar_lea.vmem %s5135_s14, %s4713_s4 }
  0xba   : > { %856 = sbr.rel (%p5198_p10) target bundleno = 832 (0x340), region = 120  ;;  %s5199_s25 = sld [smem:[#allocation20_spill]] (!%p5198_p10) }
  0xbb   : > { %s4731_s19 = scalar_lea.vmem %s5129_s8, %s4002_s6  ;;  %s846_s3 = scalar_lea.vmem %s5195_s1, %s4713_s4 }
  0xbc   : > { %s849_s18 = scalar_lea.vmem %s5196_s28, %s4713_s4  ;;  %s5200_s2 = sld [smem:[#allocation21_spill]] (!%p5198_p10) }
  0xbd   : > { %s5201_s28 = sld [smem:[#allocation23_spill]] (!%p5198_p10) }
  0xbe   : > { %s852_s24 = scalar_lea.vmem %s5197_s29, %s4713_s4  ;;  %s5202_s6 = sld [smem:[#allocation25_spill]] (!%p5198_p10) }
  0xbf   : > { %vm901_vm0 = vcmask 1041408   ;;  %v4357_v2 = vmov 0   ;;  %v863_v3 = vld [vmem:[#allocation2 + $0x30] sm:$0x3]  ;;  %v862_v4 = vld [vmem:[#allocation2 + $0x28] sm:$0xff]  ;;  %v861_v7 = vld [vmem:[#allocation2 + $0x20] sm:$0xff]  ;;  %v864_v12 = vlaneseq }
  0xc0   : > { %v867_v0 = vld [vmem:[%s5199_s25 + $0x8] sm:$0xff]  ;;  %v866_v1 = vld [vmem:[%s5199_s25] sm:$0xff]  ;;  %4089 = vset.pattern.permute.xlu1 %v4357_v2  ;;  %4088 = vset.pattern.permute.xlu0 %v4357_v2  ;;  %v860_v8 = vld [vmem:[#allocation2 + $0x18] sm:$0xff]  ;;  %vm894_vm1 = vcmask 408576   ;;  %v4358_v16 = vmov 0.0   ;;  %s5203_s23 = sld [smem:[#allocation26_spill]] }
  0xc1   : > { %872 = vperm.xlu1 %4089, %v867_v0   ;;  %869 = vperm.xlu0 %4088, %v866_v1   ;;  %v859_v9 = vld [vmem:[#allocation2 + $0x10] sm:$0xff]  ;;  %v858_v10 = vld [vmem:[#allocation2 + $0x8] sm:$0xff]  ;;  %v857_v11 = vld [vmem:[#allocation2] sm:$0xff]  ;;  %v865_v13 = vand.u32 127, %v864_v12  ;;  %s5204_s5 = sld [smem:[#allocation24_spill]] }
  0xc2   : > { %v881_v5 = vld [vmem:[%s5200_s2 + $0x8] sm:$0xff]  ;;  %v880_v6 = vld [vmem:[%s5200_s2] sm:$0xff]  ;;  %3736 = vmatprep.subr.msk.mxu0 %vm901_vm0, %v863_v3  ;;  %3753 = vmatprep.subr.msk.mxu1 %vm901_vm0, %v863_v3 }
  0xc3   : > { %3737 = vmatpush3.msk.msra.mxu0 %vm901_vm0, %v863_v3  ;;  %3754 = vmatpush3.msk.msra.mxu1 %vm901_vm0, %v863_v3  ;;  %v3558_v59 = vld [vmem:[%s5201_s28] ss:$0 sm:$0xff] }
  0xc4   : > { %3738 = vmatprep.subr.mxu0 %v862_v4  ;;  %3755 = vmatprep.subr.mxu1 %v862_v4  ;;  %v3560_v60 = vld [vmem:[%s5202_s6] ss:$0 sm:$0xff] }
  0xc5   : > { %886 = vperm.xlu1 %4089, %v881_v5   ;;  %883 = vperm.xlu0 %4088, %v880_v6  }
  0xc6   : > { %3739 = vmatpush3.msra.mxu0 %v862_v4  ;;  %3756 = vmatpush3.msra.mxu1 %v862_v4  ;;  %v3561_v0 = vld [vmem:[%s5203_s23] ss:$0 sm:$0xff] }
  0xc7   : > { %3740 = vmatprep.subr.mxu0 %v861_v7  ;;  %3757 = vmatprep.subr.mxu1 %v861_v7  ;;  %v3559_v3 = vld [vmem:[%s5204_s5] ss:$0 sm:$0xff] }
  0xc8   : > { %3741 = vmatpush3.msra.mxu0 %v861_v7  ;;  %3758 = vmatpush3.msra.mxu1 %v861_v7 }
  0xc9   : > { %3742 = vmatprep.subr.mxu0 %v860_v8  ;;  %3759 = vmatprep.subr.mxu1 %v860_v8 }
  0xca   : > { %3743 = vmatpush3.msra.mxu0 %v860_v8  ;;  %3760 = vmatpush3.msra.mxu1 %v860_v8 }
  0xcb   : > { %3744 = vmatprep.subr.mxu0 %v859_v9  ;;  %3761 = vmatprep.subr.mxu1 %v859_v9 }
  0xcc   : > { %3745 = vmatpush3.msra.mxu0 %v859_v9  ;;  %3762 = vmatpush3.msra.mxu1 %v859_v9 }
  0xcd   : > { %3746 = vmatprep.subr.mxu0 %v858_v10  ;;  %3763 = vmatprep.subr.mxu1 %v858_v10 }
  0xce   : > { %3747 = vmatpush3.msra.mxu0 %v858_v10  ;;  %3764 = vmatpush3.msra.mxu1 %v858_v10 }
  0xcf   : > { %3748 = vmatprep.subr.mxu0 %v857_v11  ;;  %3765 = vmatprep.subr.mxu1 %v857_v11 }
  0xd0   : > { %3749 = vmatpush3.msra.mxu0 %v857_v11  ;;  %3766 = vmatpush3.msra.mxu1 %v857_v11 }
 0x13c   : > { %v873_v14 = vpop.permute.xlu1 %872  ;;  %v870_v15 = vpop.permute.xlu0 %869 }
 0x13d   : > { %vm875_vm2 = vcmp.eq.s32.totalorder %v873_v14, %v865_v13  ;;  %vm874_vm3 = vcmp.eq.s32.totalorder %v870_v15, %v865_v13 }
 0x13e   : > { %v3549_v17 = vsel %vm875_vm2, 1.0, %v4358_v16  ;;  %v3548_v18 = vsel %vm874_vm3, 1.0, %v4358_v16 }
 0x13f   : > { %3750 = vmatprep.mubr.msk.f32.mxu0 %vm894_vm1, %v3548_v18 }
 0x140   : > { %v887_v19 = vpop.permute.xlu1 %886  ;;  %v884_v20 = vpop.permute.xlu0 %883  ;;  %3751 = vmatmul.mubr.msk.f32.vlgmr.msra.gmra.mxu0 %vm894_vm1, %v3549_v17 }
 0x141   : > { %vm889_vm4 = vcmp.eq.s32.totalorder %v887_v19, %v865_v13  ;;  %vm888_vm5 = vcmp.eq.s32.totalorder %v884_v20, %v865_v13 }
 0x142   : > { %v3551_v21 = vsel %vm889_vm4, 1.0, %v4358_v16  ;;  %v3550_v22 = vsel %vm888_vm5, 1.0, %v4358_v16 }
 0x143   : > { %3767 = vmatprep.mubr.msk.f32.mxu1 %vm894_vm1, %v3550_v22 }
 0x144   : > { %3768 = vmatmul.mubr.msk.f32.vlgmr.msra.gmra.mxu1 %vm894_vm1, %v3551_v21 }
 0x200   : > { %v3752_v23 = vpop.f32.mrf.mxu0 }
 0x201   : > { %1065 = vadd.xlane.f32.xlu1 %v3752_v23 }
 0x202   : > { %v971_v24 = vpop.f32.mrf.mxu0 }
 0x203   : > { %1063 = vadd.xlane.f32.xlu0 %v971_v24 }
 0x204   : > { %v3769_v25 = vpop.f32.mrf.mxu1 }
 0x206   : > { %v1052_v26 = vpop.f32.mrf.mxu1 }
 0x207   : > { %1104 = vadd.xlane.f32.xlu0 %v1052_v26 }
 0x20b   : > { %1106 = vadd.xlane.f32.xlu0 %v3769_v25 }
 0x28a   : > { %v1066_v27 = vpop.xlane.xlu1 %1065 }
 0x28b   : > { %v1069_v28 = vmul.f32 0.0078125, %v1066_v27 }
 0x28c   : > { %v1064_v29 = vpop.xlane.xlu0 %1063 }
 0x28d   : > { %v1071_v30 = vsub.f32 %v3752_v23, %v1069_v28  ;;  %v1068_v31 = vmul.f32 0.0078125, %v1064_v29 }
 0x28f   : > { %v1070_v32 = vsub.f32 %v971_v24, %v1068_v31  ;;  %v1073_v33 = vmul.f32 %v1071_v30, %v1071_v30 }
 0x290   : > { %v1105_v34 = vpop.xlane.xlu0 %1104 }
 0x291   : > { %v1108_v35 = vmul.f32 0.0078125, %v1105_v34  ;;  %1076 = vadd.xlane.f32.xlu0 %v1073_v33  ;;  %v1072_v36 = vmul.f32 %v1070_v32, %v1070_v32 }
 0x293   : > { %v1110_v37 = vsub.f32 %v1052_v26, %v1108_v35  ;;  %1074 = vadd.xlane.f32.xlu1 %v1072_v36 }
 0x294   : > { %v1107_v38 = vpop.xlane.xlu0 %1106 }
 0x295   : > { %v1109_v39 = vmul.f32 0.0078125, %v1107_v38  ;;  %v1112_v40 = vmul.f32 %v1110_v37, %v1110_v37 }
 0x297   : > { %v1111_v41 = vsub.f32 %v3769_v25, %v1109_v39  ;;  %1114 = vadd.xlane.f32.xlu1 %v1112_v40 }
 0x299   : > { %v1113_v42 = vmul.f32 %v1111_v41, %v1111_v41 }
 0x29b   : > { %1116 = vadd.xlane.f32.xlu0 %v1113_v42 }
 0x31a   : > { %v1077_v43 = vpop.xlane.xlu0 %1076 }
 0x31b   : > { %v1079_v44 = vmul.f32 0.0078125, %v1077_v43 }
 0x31c   : > { %v1075_v45 = vpop.xlane.xlu1 %1074 }
 0x31d   : > { %v1078_v46 = vmul.f32 0.0078125, %v1075_v45  ;;  %v1081_v47 = vadd.f32 1e-05, %v1079_v44 }
 0x31f   : > { %v1080_v48 = vadd.f32 1e-05, %v1078_v46 }
 0x320   : > { %v1115_v49 = vpop.xlane.xlu1 %1114 }
 0x321   : > { %4090 = vrsqrt.f32 %v1080_v48  ;;  %v1118_v50 = vmul.f32 0.0078125, %v1115_v49 }
 0x322   : > { %4092 = vrsqrt.f32 %v1081_v47 }
 0x323   : > { %v1120_v51 = vadd.f32 1e-05, %v1118_v50 }
 0x324   : > { %v1117_v52 = vpop.xlane.xlu0 %1116 }
 0x325   : > { %4094 = vrsqrt.f32 %v1120_v51  ;;  %v1119_v53 = vmul.f32 0.0078125, %v1117_v52 }
 0x327   : > { %v1121_v54 = vadd.f32 1e-05, %v1119_v53 }
 0x329   : > { %4096 = vrsqrt.f32 %v1121_v54 }
 0x32e   : > { %v4091_v55 = vpop.eup %4090 }
 0x32f   : > { %v1084_v56 = vmul.f32 %v4091_v55, %v1070_v32  ;;  %v4093_v57 = vpop.eup %4092 }
 0x330   : > { %v1085_v61 = vmul.f32 %v4093_v57, %v1071_v30 }
 0x331   : > { %v1092_v62 = vmul.f32 %v3558_v59, %v1084_v56 }
 0x332   : > { %v4095_v58 = vpop.eup %4094  ;;  %v1093_v4 = vmul.f32 %v3558_v59, %v1085_v61 }
 0x333   : > { %v1124_v63 = vmul.f32 %v4095_v58, %v1110_v37  ;;  %v1100_v5 = vadd.f32 %v3559_v3, %v1092_v62 }
 0x334   : > { %v1101_v10 = vadd.f32 %v3559_v3, %v1093_v4 }
 0x335   : > { %v1132_v1 = vmul.f32 %v3560_v60, %v1124_v63 }
 0x336   : > { %v4097_v2 = vpop.eup %4096 }
 0x337   : > { %v1140_v6 = vadd.f32 %v3561_v0, %v1132_v1  ;;  %v1125_v7 = vmul.f32 %v4097_v2, %v1111_v41 }
 0x339   : > { %v1142_v8 = vadd.f32 %v1140_v6, %v1100_v5  ;;  %v1133_v9 = vmul.f32 %v3560_v60, %v1125_v7 }
 0x33b   : > { %1144 = vst [vmem:[#allocation11] sm:$0xff] %v1142_v8  ;;  %v1141_v11 = vadd.f32 %v3561_v0, %v1133_v9 }
 0x33d   : > { %v1143_v12 = vadd.f32 %v1141_v11, %v1101_v10 }
 0x33f   : > { %1145 = vst [vmem:[#allocation11 + $0x8] sm:$0xff] %v1143_v12 }
 0x340 PF: > { %v1194_v13 = vld [vmem:[%s4697_s20 + $0x170] sm:$0xff]  ;;  %v1193_v14 = vld [vmem:[%s4697_s20 + $0x168] sm:$0xff]  ;;  %v1191_v15 = vld [vmem:[%s4697_s20 + $0x158] sm:$0xff]  ;;  %v4359_v17 = vmov 0.0   ;;  %vm4360_vm6 = vmmov 0   ;;  %v1198_v0 = vlaneseq  ;;  %vm1367_vm7 = vcmask 261120   ;;  %s5205_s27 = scalar_lea.vmem %s5131_s10, %s4713_s4  ;;  %s5206_s16 = scalar_lea.vmem %s5132_s11, %s4713_s4 }
 0x341   : > { %1213 = vmatprep.subr.mxu0 %v1194_v13  ;;  %v1190_v16 = vld [vmem:[%s4697_s20 + $0x150] sm:$0xff]  ;;  %1277 = vmatprep.mubr.f32.mxu0 %v4359_v17  ;;  %v1188_v18 = vld [vmem:[%s4697_s20 + $0x140] sm:$0xff]  ;;  %v1187_v19 = vld [vmem:[%s4697_s20 + $0x138] sm:$0xff]  ;;  %vm1520_vm8 = vcmask 64512   ;;  %s4363_s0 = smov 32   ;;  %s5207_s17 = scalar_lea.vmem %s5133_s12, %s4713_s4 }
 0x342   : > { %1214 = vmatpush1.msra.mxu0 %v1193_v14  ;;  %v1185_v20 = vld [vmem:[%s4697_s20 + $0x128] sm:$0xff]  ;;  %v1184_v21 = vld [vmem:[%s4697_s20 + $0x120] sm:$0xff]  ;;  %v1182_v22 = vld [vmem:[%s4697_s20 + $0x110] sm:$0xff]  ;;  %v1199_v1 = vshrl.u32 %v1198_v0, 7  ;;  %p4039_p11 = scmp.eq.s32.totalorder %s4592_s22, 3 }
 0x343   : > { %1215 = vmatprep.subr.mxu0 %v1191_v15  ;;  %v1181_v23 = vld [vmem:[%s4697_s20 + $0x108] sm:$0xff]  ;;  %v1179_v24 = vld [vmem:[%s4697_s20 + $0xf8] sm:$0xff]  ;;  %v1178_v25 = vld [vmem:[%s4697_s20 + $0xf0] sm:$0xff] }
 0x344   : > { %1216 = vmatpush1.msra.mxu0 %v1190_v16  ;;  %v1176_v26 = vld [vmem:[%s4697_s20 + $0xe0] sm:$0xff]  ;;  %v1175_v28 = vld [vmem:[%s4697_s20 + $0xd8] sm:$0xff]  ;;  %v1173_v31 = vld [vmem:[%s4697_s20 + $0xc8] sm:$0xff]  ;;  %v1200_v2 = vsub.s32 0, %v1199_v1  ;;  %v1204_v4 = vsub.s32 1, %v1199_v1  ;;  %v1208_v7 = vsub.s32 2, %v1199_v1 }
 0x345   : > { %1217 = vmatprep.subr.mxu0 %v1188_v18  ;;  %v4791_v27 = vld [vmem:[#allocation11] sm:$0xff]  ;;  %v1195_v29 = vld [vmem:[%s4697_s20 + $0x178] sm:$0xff]  ;;  %v1189_v33 = vld [vmem:[%s4697_s20 + $0x148] sm:$0xff] }
 0x346   : > { %1218 = vmatpush1.msra.mxu0 %v1187_v19  ;;  %v1192_v30 = vld [vmem:[%s4697_s20 + $0x160] sm:$0xff]  ;;  %3802 = vmatprep.mubr.f32.mxu1 %v4791_v27  ;;  %v1170_v34 = vld [vmem:[%s4697_s20 + $0xb0] sm:$0xff]  ;;  %v1169_v35 = vld [vmem:[%s4697_s20 + $0xa8] sm:$0xff] }
 0x347   : > { %1219 = vmatprep.subr.mxu0 %v1185_v20  ;;  %3770 = vmatprep.subr.mxu1 %v1195_v29  ;;  %v1172_v32 = vld [vmem:[%s4697_s20 + $0xc0] sm:$0xff]  ;;  %v1186_v36 = vld [vmem:[%s4697_s20 + $0x130] sm:$0xff]  ;;  %v1167_v37 = vld [vmem:[%s4697_s20 + $0x98] sm:$0xff] }
 0x348   : > { %1220 = vmatpush1.msra.mxu0 %v1184_v21  ;;  %3771 = vmatpush3.msra.mxu1 %v1195_v29  ;;  %v1166_v38 = vld [vmem:[%s4697_s20 + $0x90] sm:$0xff]  ;;  %v1183_v39 = vld [vmem:[%s4697_s20 + $0x118] sm:$0xff]  ;;  %v1164_v40 = vld [vmem:[%s4697_s20 + $0x80] sm:$0xff] }
 0x349   : > { %1221 = vmatprep.subr.mxu0 %v1182_v22  ;;  %3772 = vmatprep.subr.mxu1 %v1192_v30  ;;  %v1163_v41 = vld [vmem:[%s4697_s20 + $0x78] sm:$0xff]  ;;  %v1180_v42 = vld [vmem:[%s4697_s20 + $0x100] sm:$0xff]  ;;  %v1161_v43 = vld [vmem:[%s4697_s20 + $0x68] sm:$0xff] }
 0x34a   : > { %1222 = vmatpush1.msra.mxu0 %v1181_v23  ;;  %3773 = vmatpush3.msra.mxu1 %v1192_v30  ;;  %v1160_v44 = vld [vmem:[%s4697_s20 + $0x60] sm:$0xff]  ;;  %v1177_v45 = vld [vmem:[%s4697_s20 + $0xe8] sm:$0xff]  ;;  %v1158_v46 = vld [vmem:[%s4697_s20 + $0x50] sm:$0xff] }
 0x34b   : > { %1223 = vmatprep.subr.mxu0 %v1179_v24  ;;  %3774 = vmatprep.subr.mxu1 %v1189_v33  ;;  %v1157_v47 = vld [vmem:[%s4697_s20 + $0x48] sm:$0xff]  ;;  %v1174_v48 = vld [vmem:[%s4697_s20 + $0xd0] sm:$0xff]  ;;  %v1155_v49 = vld [vmem:[%s4697_s20 + $0x38] sm:$0xff] }
 0x34c   : > { %1224 = vmatpush1.msra.mxu0 %v1178_v25  ;;  %3775 = vmatpush3.msra.mxu1 %v1189_v33  ;;  %v1154_v50 = vld [vmem:[%s4697_s20 + $0x30] sm:$0xff]  ;;  %v1171_v51 = vld [vmem:[%s4697_s20 + $0xb8] sm:$0xff]  ;;  %v1152_v52 = vld [vmem:[%s4697_s20 + $0x20] sm:$0xff] }
 0x34d   : > { %1225 = vmatprep.subr.mxu0 %v1176_v26  ;;  %3776 = vmatprep.subr.mxu1 %v1186_v36  ;;  %v1151_v53 = vld [vmem:[%s4697_s20 + $0x18] sm:$0xff]  ;;  %v1168_v54 = vld [vmem:[%s4697_s20 + $0xa0] sm:$0xff]  ;;  %v1149_v55 = vld [vmem:[%s4697_s20 + $0x8] sm:$0xff] }
 0x34e   : > { %1226 = vmatpush1.msra.mxu0 %v1175_v28  ;;  %3777 = vmatpush3.msra.mxu1 %v1186_v36  ;;  %v1148_v56 = vld [vmem:[%s4697_s20] sm:$0xff]  ;;  %v1165_v57 = vld [vmem:[%s4697_s20 + $0x88] sm:$0xff]  ;;  %v1162_v58 = vld [vmem:[%s4697_s20 + $0x70] sm:$0xff] }
 0x34f   : > { %1227 = vmatprep.subr.mxu0 %v1173_v31  ;;  %3778 = vmatprep.subr.mxu1 %v1183_v39  ;;  %v1159_v59 = vld [vmem:[%s4697_s20 + $0x58] sm:$0xff]  ;;  %v4828_v60 = vld [vmem:[#allocation11 + $0x8] sm:$0xff]  ;;  %v1156_v61 = vld [vmem:[%s4697_s20 + $0x40] sm:$0xff] }
 0x350   : > { %1228 = vmatpush1.msra.mxu0 %v1172_v32  ;;  %3779 = vmatpush3.msra.mxu1 %v1183_v39  ;;  %v1153_v62 = vld [vmem:[%s4697_s20 + $0x28] sm:$0xff]  ;;  %v1150_v63 = vld [vmem:[%s4697_s20 + $0x10] sm:$0xff]  ;;  %s4361_s20 = smov 96  }
 0x351   : > { %1229 = vmatprep.subr.mxu0 %v1170_v34  ;;  %3780 = vmatprep.subr.mxu1 %v1180_v42  ;;  %v1196_v3 = vld [vmem:[%s4731_s19] sm:$0x7]  ;;  %s4362_s19 = smov 64  }
 0x352   : > { %1230 = vmatpush1.msra.mxu0 %v1169_v35  ;;  %3781 = vmatpush3.msra.mxu1 %v1180_v42  ;;  %v1201_v5 = vrot.slane %v1196_v3, %v1200_v2  ;;  %v1205_v6 = vrot.slane %v1196_v3, %v1204_v4  ;;  %v1209_v9 = vrot.slane %v1196_v3, %v1208_v7 }
 0x353   : > { %1231 = vmatprep.subr.mxu0 %v1167_v37  ;;  %3782 = vmatprep.subr.mxu1 %v1177_v45 }
 0x354   : > { %1232 = vmatpush1.msra.mxu0 %v1166_v38  ;;  %3783 = vmatpush3.msra.mxu1 %v1177_v45 }
 0x355   : > { %1233 = vmatprep.subr.mxu0 %v1164_v40  ;;  %3784 = vmatprep.subr.mxu1 %v1174_v48 }
 0x356   : > { %1234 = vmatpush1.msra.mxu0 %v1163_v41  ;;  %3785 = vmatpush3.msra.mxu1 %v1174_v48 }
 0x357   : > { %1235 = vmatprep.subr.mxu0 %v1161_v43  ;;  %3786 = vmatprep.subr.mxu1 %v1171_v51 }
 0x358   : > { %1236 = vmatpush1.msra.mxu0 %v1160_v44  ;;  %3787 = vmatpush3.msra.mxu1 %v1171_v51 }
 0x359   : > { %1237 = vmatprep.subr.mxu0 %v1158_v46  ;;  %3788 = vmatprep.subr.mxu1 %v1168_v54 }
 0x35a   : > { %1238 = vmatpush1.msra.mxu0 %v1157_v47  ;;  %3789 = vmatpush3.msra.mxu1 %v1168_v54 }
 0x35b   : > { %1239 = vmatprep.subr.mxu0 %v1155_v49  ;;  %3790 = vmatprep.subr.mxu1 %v1165_v57 }
 0x35c   : > { %1240 = vmatpush1.msra.mxu0 %v1154_v50  ;;  %3791 = vmatpush3.msra.mxu1 %v1165_v57 }
 0x35d   : > { %1241 = vmatprep.subr.mxu0 %v1152_v52  ;;  %3792 = vmatprep.subr.mxu1 %v1162_v58 }
 0x35e   : > { %1242 = vmatpush1.msra.mxu0 %v1151_v53  ;;  %3793 = vmatpush3.msra.mxu1 %v1162_v58 }
 0x35f   : > { %1243 = vmatprep.subr.mxu0 %v1149_v55  ;;  %3794 = vmatprep.subr.mxu1 %v1159_v59 }
 0x360   : > { %1244 = vmatpush1.msra.mxu0 %v1148_v56  ;;  %3795 = vmatpush3.msra.mxu1 %v1159_v59 }
 0x361   : > { %1278 = vmatmul.mubr.f32.vlgmr.msra.gmra.mxu0 %v4791_v27  ;;  %3810 = vmatprep.subr.mxu0 %v4359_v17 }
 0x362   : > { %1283 = vmatprep.mubr.f32.mxu0 %v4359_v17  ;;  %3796 = vmatprep.subr.mxu1 %v1156_v61 }
 0x363   : > { %3797 = vmatpush3.msra.mxu1 %v1156_v61 }
 0x364   : > { %3798 = vmatprep.subr.mxu1 %v1153_v62 }
 0x365   : > { %1284 = vmatmul.mubr.f32.gmra.mxu0 %v4828_v60  ;;  %3799 = vmatpush3.msra.mxu1 %v1153_v62 }
 0x366   : > { %3800 = vmatprep.subr.mxu1 %v1150_v63  ;;  %3812 = vmatprep.mubr.msk.f32.mxu0 %vm4360_vm6, %v4359_v17 }
 0x367   : > { %3801 = vmatpush3.msra.mxu1 %v1150_v63 }
 0x368   : > { %3803 = vmatmul.mubr.f32.vlgmr.msra.gmra.mxu1 %v4828_v60  ;;  %3805 = vmatprep.subr.mxu1 %v4359_v17 }
 0x369   : > { %3807 = vmatprep.mubr.msk.f32.mxu1 %vm4360_vm6, %v4359_v17 }
 0x421   : > { %v1279_v8 = vpop.f32.mrf.mxu0 }
 0x422   : > { %v1280_v10 = vadd.f32 %v1279_v8, %v1201_v5 }
 0x423   : > { %v1281_v11 = vpop.f32.mrf.mxu0 }
 0x424   : > { %v4842_v12 = vadd.f32 %v1281_v11, %v1205_v6  ;;  %v4846_v14 = vmul.f32 0.17677669, %v1280_v10 }
 0x425   : > { %v1285_v13 = vpop.f32.mrf.mxu0 }
 0x426   : > { %3806 = vmatpush3.xpose.msk.msra.mxu1 %vm1367_vm7, %v4842_v12  ;;  %v1286_v15 = vadd.f32 %v1285_v13, %v1201_v5  ;;  %v2028_v13 = vld [vmem:[%s4703_s7 + $0x38] sm:$0xff] }
 0x427   : > { %v1287_v16 = vpop.f32.mrf.mxu0  ;;  %3815 = vmatprep.subr.mxu1 %v4359_v17 }
 0x428   : > { %v4849_v18 = vadd.f32 %v1287_v16, %v1205_v6  ;;  %v4857_v19 = vmul.f32 0.17677669, %v1286_v15  ;;  %v3804_v20 = vpop.f32.mrf.mxu1 }
 0x429   : > { %3808 = vmatmul.mubr.msk.f32.vlgmr.msra.gmra.mxu1 %vm1367_vm7, %v4846_v14  ;;  %v4868_v21 = vadd.f32 %v3804_v20, %v1209_v9 }
 0x42a   : > { %1773 = vrot.lane.b32.xlu1 %v4849_v18, %s4361_s20  ;;  %3811 = vmatpush3.xpose.msk.msra.mxu0 %vm1367_vm7, %v4849_v18  ;;  %v1356_v22 = vpop.f32.mrf.mxu1 }
 0x42b   : > { %3820 = vmatprep.subr.mxu0 %v4359_v17  ;;  %3817 = vmatprep.mubr.msk.f32.mxu1 %vm4360_vm6, %v4359_v17  ;;  %v4870_v23 = vadd.f32 %v1356_v22, %v1209_v9  ;;  %v1692_v9 = vld [vmem:[%s4703_s7 + $0x18] sm:$0xff]  ;;  %v2027_v22 = vld [vmem:[%s4703_s7 + $0x30] sm:$0xff] }
 0x42d   : > { %3813 = vmatmul.mubr.msk.f32.vlgmr.msra.gmra.mxu0 %vm1367_vm7, %v4857_v19  ;;  %3816 = vmatpush3.msra.mxu1 %v4870_v23 }
 0x42e   : > { %1693 = vrot.lane.b32.xlu1 %v4846_v14, %s4361_s20  ;;  %3822 = vmatprep.mubr.msk.f32.mxu0 %vm4360_vm6, %v4359_v17 }
 0x42f   : > { %3821 = vmatpush3.msra.mxu0 %v4868_v21  ;;  %3825 = vmatprep.subr.mxu1 %v4359_v17 }
 0x430   : > { %3830 = vmatprep.subr.mxu0 %v4359_v17 }
 0x49c   : > { %v1774_v41 = vpop.permute.xlu1 %1773 }
 0x4a0   : > { %v1694_v42 = vpop.permute.xlu1 %1693 }
 0x4e9   : > { %v1440_v24 = vpop.f32.mrf.mxu1 }
 0x4ea   : > { %v1521_v25 = vsel %vm1520_vm8, %v1440_v24, -inf }
 0x4eb   : > { %1522 = vmax.xlane.f32.xlu0 %v1521_v25  ;;  %v3809_v26 = vpop.f32.mrf.mxu1 }
 0x4ec   : > { %v1690_v26 = vld [vmem:[%s4703_s7 + $0x8] sm:$0xff] }
 0x4ed   : > { %v1516_v28 = vpop.f32.mrf.mxu0 }
 0x4ee   : > { %v1524_v29 = vsel %vm1520_vm8, %v1516_v28, -inf }
 0x4ef   : > { %v3814_v30 = vpop.f32.mrf.mxu0  ;;  %1525 = vmax.xlane.f32.xlu0 %v1524_v29 }
 0x505   : > { %1695 = vrot.lane.b32.xlu0 %v4842_v12, %s4361_s20 }
 0x574   : > { %v1523_v31 = vpop.xlane.xlu0 %1522 }
 0x575   : > { %v1527_v32 = vsub.f32 %v1440_v24, %v1523_v31  ;;  %v2026_v31 = vld [vmem:[%s4703_s7 + $0x28] sm:$0xff] }
 0x577   : > { %v1529_v33 = vmul.f32 1.442695, %v1527_v32  ;;  %v2025_v32 = vld [vmem:[%s4703_s7 + $0x20] sm:$0xff] }
 0x578   : > { %v1526_v34 = vpop.xlane.xlu0 %1525 }
 0x579   : > { %4098 = vpow2.f32 %v1529_v33  ;;  %v1528_v35 = vsub.f32 %v1516_v28, %v1526_v34  ;;  %v1689_v28 = vld [vmem:[%s4703_s7] sm:$0xff] }
 0x57b   : > { %v1531_v36 = vmul.f32 1.442695, %v1528_v35 }
 0x57c   : > { %v1696_v47 = vpop.permute.xlu0 %1695 }
 0x57d   : > { %4100 = vpow2.f32 %v1531_v36 }
 0x586   : > { %v4099_v37 = vpop.eup %4098 }
 0x587   : > { %v1533_v38 = vsel %vm1520_vm8, %v4099_v37, 0.0 }
 0x588   : > { %1534 = vadd.xlane.f32.xlu1 %v1533_v38 }
 0x58a   : > { %v4101_v39 = vpop.eup %4100 }
 0x58b   : > { %v1536_v40 = vsel %vm1520_vm8, %v4101_v39, 0.0 }
 0x58c   : > { %1537 = vadd.xlane.f32.xlu1 %v1536_v40 }
 0x59d   : > { %1771 = vrot.lane.b32.xlu1 %v4857_v19, %s4361_s20 }
 0x611   : > { %v1535_v43 = vpop.xlane.xlu1 %1534 }
 0x612   : > { %4102 = vrcp.f32 %v1535_v43 }
 0x615   : > { %v1538_v44 = vpop.xlane.xlu1 %1537 }
 0x616   : > { %4104 = vrcp.f32 %v1538_v44 }
 0x619   : > { %v1772_v50 = vpop.permute.xlu1 %1771 }
 0x61f   : > { %v4103_v45 = vpop.eup %4102 }
 0x620   : > { %v1541_v46 = vmul.f32 %v4103_v45, %v4099_v37 }
 0x622   : > { %3818 = vmatmul.mubr.msk.f32.vlgmr.msra.gmra.mxu1 %vm1520_vm8, %v1541_v46 }
 0x623   : > { %v4105_v48 = vpop.eup %4104  ;;  %3826 = vmatpush3.xpose.msk.msra.mxu1 %vm1367_vm7, %v1696_v47  ;;  %3827 = vmatprep.mubr.msk.f32.mxu1 %vm4360_vm6, %v4359_v17 }
 0x624   : > { %v1542_v49 = vmul.f32 %v4105_v48, %v4101_v39  ;;  %3835 = vmatprep.subr.mxu1 %v4359_v17 }
 0x626   : > { %3823 = vmatmul.mubr.msk.f32.vlgmr.msra.gmra.mxu0 %vm1520_vm8, %v1542_v49  ;;  %3828 = vmatmul.mubr.msk.f32.vlgmr.msra.gmra.mxu1 %vm1367_vm7, %v1694_v42 }
 0x627   : > { %3831 = vmatpush3.xpose.msk.msra.mxu0 %vm1367_vm7, %v1774_v41  ;;  %3832 = vmatprep.mubr.msk.f32.mxu0 %vm4360_vm6, %v4359_v17 }
 0x628   : > { %3840 = vmatprep.subr.mxu0 %v4359_v17  ;;  %3837 = vmatprep.mubr.msk.f32.mxu1 %vm4360_vm6, %v4359_v17 }
 0x62a   : > { %3833 = vmatmul.mubr.msk.f32.vlgmr.msra.gmra.mxu0 %vm1367_vm7, %v1772_v50 }
 0x62b   : > { %3842 = vmatprep.mubr.msk.f32.mxu0 %vm4360_vm6, %v4359_v17 }
 0x6e2   : > { %v1612_v51 = vpop.f32.mrf.mxu1 }
 0x6e4   : > { %v3819_v52 = vpop.f32.mrf.mxu1 }
 0x6e6   : > { %v4900_v53 = vpop.f32.mrf.mxu0  ;;  %v1767_v54 = vpop.f32.mrf.mxu1 }
 0x6e7   : > { %v1849_v55 = vsel %vm1520_vm8, %v1767_v54, -inf }
 0x6e8   : > { %v3824_v56 = vpop.f32.mrf.mxu0  ;;  %1850 = vmax.xlane.f32.xlu0 %v1849_v55  ;;  %v3829_v57 = vpop.f32.mrf.mxu1 }
 0x6ea   : > { %v1845_v58 = vpop.f32.mrf.mxu0 }
 0x6eb   : > { %v1852_v59 = vsel %vm1520_vm8, %v1845_v58, -inf }
 0x6ec   : > { %1853 = vmax.xlane.f32.xlu1 %v1852_v59  ;;  %v3834_v61 = vpop.f32.mrf.mxu0 }
 0x6fd   : > { %1949 = vrot.lane.b32.xlu1 %v4868_v21, %s4361_s20 }
 0x701   : > { %2271 = vrot.lane.b32.xlu1 %v4849_v18, %s4362_s19 }
 0x705   : > { %2269 = vrot.lane.b32.xlu1 %v4857_v19, %s4362_s19 }
 0x709   : > { %2191 = vrot.lane.b32.xlu1 %v4846_v14, %s4362_s19 }
 0x70d   : > { %2610 = vrot.lane.b32.xlu1 %v4842_v12, %s4363_s0 }
 0x771   : > { %v1851_v62 = vpop.xlane.xlu0 %1850 }
 0x772   : > { %v1855_v63 = vsub.f32 %v1767_v54, %v1851_v62 }
 0x774   : > { %v1857_v0 = vmul.f32 1.442695, %v1855_v63 }
 0x775   : > { %v1854_v1 = vpop.xlane.xlu1 %1853 }
 0x776   : > { %4106 = vpow2.f32 %v1857_v0  ;;  %v1856_v2 = vsub.f32 %v1845_v58, %v1854_v1 }
 0x778   : > { %v1859_v3 = vmul.f32 1.442695, %v1856_v2 }
 0x779   : > { %v1950_v4 = vpop.permute.xlu1 %1949 }
 0x77a   : > { %4108 = vpow2.f32 %v1859_v3  ;;  %3841 = vmatpush3.msra.mxu0 %v1950_v4 }
 0x77b   : > { %3856 = vmatprep.subr.mxu0 %v1692_v9 }
 0x77d   : > { %v2272_v29 = vpop.permute.xlu1 %2271 }
 0x781   : > { %v2270_v30 = vpop.permute.xlu1 %2269 }
 0x783   : > { %v4107_v5 = vpop.eup %4106 }
 0x784   : > { %v1861_v6 = vsel %vm1520_vm8, %v4107_v5, 0.0 }
 0x785   : > { %1862 = vadd.xlane.f32.xlu0 %v1861_v6  ;;  %v2192_v38 = vpop.permute.xlu1 %2191 }
 0x787   : > { %v4109_v7 = vpop.eup %4108 }
 0x788   : > { %v1864_v8 = vsel %vm1520_vm8, %v4109_v7, 0.0 }
 0x789   : > { %1865 = vadd.xlane.f32.xlu0 %v1864_v8 }
 0x79f   : > { %1872 = vrot.lane.b32.xlu0 %v4870_v23, %s4361_s20 }
 0x7a3   : > { %2193 = vrot.lane.b32.xlu0 %v4842_v12, %s4362_s19  ;;  %v1691_v12 = vld [vmem:[%s4703_s7 + $0x10] sm:$0xff] }
 0x80e   : > { %v1863_v10 = vpop.xlane.xlu0 %1862 }
 0x80f   : > { %4110 = vrcp.f32 %v1863_v10 }
 0x812   : > { %v1866_v11 = vpop.xlane.xlu0 %1865 }
 0x813   : > { %4112 = vrcp.f32 %v1866_v11 }
 0x816   : > { %v1873_v15 = vpop.permute.xlu0 %1872 }
 0x817   : > { %3836 = vmatpush3.msra.mxu1 %v1873_v15  ;;  %v2524_v15 = vld [vmem:[%s4703_s7 + $0x58] sm:$0xff] }
 0x818   : > { %3845 = vmatprep.subr.mxu1 %v2028_v13 }
 0x81a   : > { %v2194_v36 = vpop.permute.xlu0 %2193 }
 0x81c   : > { %v4111_v16 = vpop.eup %4110 }
 0x81d   : > { %v1869_v20 = vmul.f32 %v4111_v16, %v4107_v5  ;;  %v2523_v16 = vld [vmem:[%s4703_s7 + $0x50] sm:$0xff] }
 0x81f   : > { %3838 = vmatmul.mubr.msk.f32.vlgmr.msra.gmra.mxu1 %vm1520_vm8, %v1869_v20  ;;  %v2522_v20 = vld [vmem:[%s4703_s7 + $0x48] sm:$0xff] }
 0x820   : > { %v4113_v24 = vpop.eup %4112  ;;  %3846 = vmatpush3.msra.mxu1 %v2028_v13 }
 0x821   : > { %v1870_v25 = vmul.f32 %v4113_v24, %v4109_v7  ;;  %3847 = vmatprep.subr.mxu1 %v2027_v22 }
 0x822   : > { %3848 = vmatpush3.msra.mxu1 %v2027_v22  ;;  %v2521_v22 = vld [vmem:[%s4703_s7 + $0x40] sm:$0xff] }
 0x823   : > { %3843 = vmatmul.mubr.msk.f32.vlgmr.msra.gmra.mxu0 %vm1520_vm8, %v1870_v25  ;;  %3849 = vmatprep.subr.mxu1 %v2026_v31 }
 0x824   : > { %3857 = vmatpush3.msra.mxu0 %v1692_v9  ;;  %3864 = vmatprep.mubr.msk.f32.mxu0 %vm1367_vm7, %v1612_v51 }
 0x825   : > { %3858 = vmatprep.subr.mxu0 %v1691_v12  ;;  %3850 = vmatpush3.msra.mxu1 %v2026_v31 }
 0x826   : > { %3859 = vmatpush3.msra.mxu0 %v1691_v12  ;;  %3851 = vmatprep.subr.mxu1 %v2025_v32 }
 0x827   : > { %3860 = vmatprep.subr.mxu0 %v1690_v26  ;;  %3852 = vmatpush3.msra.mxu1 %v2025_v32 }
 0x828   : > { %3861 = vmatpush3.msra.mxu0 %v1690_v26  ;;  %3867 = vmatprep.subr.mxu1 %v4359_v17 }
 0x829   : > { %3862 = vmatprep.subr.mxu0 %v1689_v28 }
 0x82a   : > { %3863 = vmatpush3.msra.mxu0 %v1689_v28 }
 0x82b   : > { %3865 = vmatmul.mubr.msk.f32.vlgmr.msra.gmra.mxu0 %vm1367_vm7, %v4900_v53  ;;  %3872 = vmatprep.subr.mxu0 %v4359_v17  ;;  %v2611_v53 = vpop.permute.xlu1 %2610 }
 0x82c   : > { %3873 = vmatpush3.xpose.msk.msra.mxu0 %vm1367_vm7, %v2272_v29  ;;  %3874 = vmatprep.mubr.msk.f32.mxu0 %vm4360_vm6, %v4359_v17 }
 0x82d   : > { %3882 = vmatprep.subr.mxu0 %v4359_v17 }
 0x82f   : > { %3875 = vmatmul.mubr.msk.f32.vlgmr.msra.gmra.mxu0 %vm1367_vm7, %v2270_v30 }
 0x830   : > { %3884 = vmatprep.mubr.msk.f32.mxu0 %vm4360_vm6, %v4359_v17 }
 0x8df   : > { %v1944_v33 = vpop.f32.mrf.mxu1 }
 0x8e0   : > { %3853 = vmatprep.mubr.msk.f32.mxu1 %vm1367_vm7, %v1944_v33 }
 0x8e1   : > { %v3839_v34 = vpop.f32.mrf.mxu1 }
 0x8e3   : > { %v2021_v35 = vpop.f32.mrf.mxu0 }
 0x8e4   : > { %3854 = vmatmul.mubr.msk.f32.vlgmr.msra.gmra.mxu1 %vm1367_vm7, %v2021_v35 }
 0x8e5   : > { %3868 = vmatpush3.xpose.msk.msra.mxu1 %vm1367_vm7, %v2194_v36  ;;  %v3844_v37 = vpop.f32.mrf.mxu0  ;;  %3869 = vmatprep.mubr.msk.f32.mxu1 %vm4360_vm6, %v4359_v17 }
 0x8e6   : > { %3877 = vmatprep.subr.mxu1 %v4359_v17 }
 0x8e8   : > { %3870 = vmatmul.mubr.msk.f32.vlgmr.msra.gmra.mxu1 %vm1367_vm7, %v2192_v38  ;;  %v2941_v38 = vld [vmem:[%s4703_s7 + $0x78] sm:$0xff] }
 0x8e9   : > { %3879 = vmatprep.mubr.msk.f32.mxu1 %vm4360_vm6, %v4359_v17 }
 0x8eb   : > { %v4951_v39 = vpop.f32.mrf.mxu0 }
 0x8ed   : > { %v4953_v40 = vpop.f32.mrf.mxu0 }
 0x8ef   : > { %v2343_v41 = vpop.f32.mrf.mxu0 }
 0x8f0   : > { %v2350_v42 = vsel %vm1520_vm8, %v2343_v41, -inf }
 0x8f1   : > { %2351 = vmax.xlane.f32.xlu0 %v2350_v42  ;;  %v3876_v43 = vpop.f32.mrf.mxu0 }
 0x8f2   : > { %v2940_v43 = vld [vmem:[%s4703_s7 + $0x70] sm:$0xff] }
 0x907   : > { %2445 = vrot.lane.b32.xlu0 %v4868_v21, %s4362_s19 }
 0x90b   : > { %2608 = vrot.lane.b32.xlu0 %v4846_v14, %s4363_s0 }
 0x90f   : > { %2686 = vrot.lane.b32.xlu0 %v4857_v19, %s4363_s0 }
 0x97a   : > { %v2352_v44 = vpop.xlane.xlu0 %2351 }
 0x97b   : > { %v2354_v45 = vsub.f32 %v2343_v41, %v2352_v44 }
 0x97d   : > { %v2357_v46 = vmul.f32 1.442695, %v2354_v45 }
 0x97e   : > { %v2446_v47 = vpop.permute.xlu0 %2445 }
 0x97f   : > { %4114 = vpow2.f32 %v2357_v46  ;;  %3883 = vmatpush3.msra.mxu0 %v2446_v47  ;;  %v2938_v46 = vld [vmem:[%s4703_s7 + $0x60] sm:$0xff] }
 0x980   : > { %3898 = vmatprep.subr.mxu0 %v4359_v17 }
 0x982   : > { %v2609_v57 = vpop.permute.xlu0 %2608 }
 0x986   : > { %v2687_v58 = vpop.permute.xlu0 %2686 }
 0x98c   : > { %v4115_v48 = vpop.eup %4114 }
 0x98d   : > { %v2362_v49 = vsel %vm1520_vm8, %v4115_v48, 0.0 }
 0x98e   : > { %2363 = vadd.xlane.f32.xlu1 %v2362_v49 }
 0x99f   : > { %2688 = vrot.lane.b32.xlu1 %v4849_v18, %s4363_s0 }
 0x9a4   : > { %v4966_v50 = vpop.f32.mrf.mxu1 }
 0x9a5   : > { %v2188_v47 = vadd.f32 %v4951_v39, %v4966_v50  ;;  %v3594_v39 = vld [vmem:[%s5205_s27] ss:$0 sm:$0xff] }
 0x9a6   : > { %v4968_v14 = vpop.f32.mrf.mxu1 }
 0x9a8   : > { %v2265_v19 = vpop.f32.mrf.mxu1 }
 0x9a9   : > { %v2347_v52 = vsel %vm1520_vm8, %v2265_v19, -inf }
 0x9aa   : > { %v3871_v51 = vpop.f32.mrf.mxu1 }
 0x9c3   : > { %2348 = vmax.xlane.f32.xlu1 %v2347_v52 }
 0xa17   : > { %v2364_v54 = vpop.xlane.xlu1 %2363 }
 0xa18   : > { %4116 = vrcp.f32 %v2364_v54 }
 0xa1b   : > { %v2689_v18 = vpop.permute.xlu1 %2688 }
 0xa25   : > { %v4117_v55 = vpop.eup %4116 }
 0xa26   : > { %v2368_v56 = vmul.f32 %v4117_v55, %v4115_v48  ;;  %v2183_v55 = vadd.f32 %v4953_v40, %v4968_v14  ;;  %v3091_v40 = vld [vmem:[%s4705_s13 + $0x70] sm:$0xff] }
 0xa28   : > { %3885 = vmatmul.mubr.msk.f32.vlgmr.msra.gmra.mxu0 %vm1520_vm8, %v2368_v56 }
 0xa29   : > { %3899 = vmatpush3.xpose.msk.msra.mxu0 %vm1367_vm7, %v2611_v53  ;;  %3900 = vmatprep.mubr.msk.f32.mxu0 %vm4360_vm6, %v4359_v17 }
 0xa2a   : > { %3903 = vmatprep.subr.mxu0 %v4359_v17 }
 0xa2c   : > { %3901 = vmatmul.mubr.msk.f32.vlgmr.msra.gmra.mxu0 %vm1367_vm7, %v2609_v57 }
 0xa2d   : > { %3904 = vmatpush3.xpose.msk.msra.mxu0 %vm1367_vm7, %v2689_v18  ;;  %3905 = vmatprep.mubr.msk.f32.mxu0 %vm4360_vm6, %v4359_v17 }
 0xa2e   : > { %3913 = vmatprep.subr.mxu0 %v4359_v17 }
 0xa30   : > { %3906 = vmatmul.mubr.msk.f32.vlgmr.msra.gmra.mxu0 %vm1367_vm7, %v2687_v58 }
 0xa31   : > { %3915 = vmatprep.mubr.msk.f32.mxu0 %vm4360_vm6, %v4359_v17 }
 0xa4c   : > { %v2349_v59 = vpop.xlane.xlu1 %2348 }
 0xa4d   : > { %v2353_v61 = vsub.f32 %v2265_v19, %v2349_v59 }
 0xa4f   : > { %v2355_v62 = vmul.f32 1.442695, %v2353_v61 }
 0xa51   : > { %4118 = vpow2.f32 %v2355_v62 }
 0xa5e   : > { %v4119_v63 = vpop.eup %4118 }
 0xa5f   : > { %v2359_v0 = vsel %vm1520_vm8, %v4119_v63, 0.0 }
 0xa60   : > { %2360 = vadd.xlane.f32.xlu0 %v2359_v0  ;;  %v3092_v0 = vld [vmem:[%s4705_s13 + $0x78] sm:$0xff] }
 0xa76   : > { %2369 = vrot.lane.b32.xlu0 %v4870_v23, %s4362_s19 }
 0xa7a   : > { %2862 = vrot.lane.b32.xlu0 %v4868_v21, %s4363_s0 }
 0xae8   : > { %v2517_v1 = vpop.f32.mrf.mxu0 }
 0xae9   : > { %v2361_v2 = vpop.xlane.xlu0 %2360 }
 0xaea   : > { %4120 = vrcp.f32 %v2361_v2  ;;  %v3886_v3 = vpop.f32.mrf.mxu0 }
 0xaec   : > { %v2682_v4 = vpop.f32.mrf.mxu0 }
 0xaed   : > { %v2370_v5 = vpop.permute.xlu0 %2369  ;;  %v2764_v6 = vsel %vm1520_vm8, %v2682_v4, -inf }
 0xaee   : > { %v3902_v7 = vpop.f32.mrf.mxu0  ;;  %2765 = vmax.xlane.f32.xlu1 %v2764_v6  ;;  %3878 = vmatpush3.msra.mxu1 %v2370_v5  ;;  %v3090_v6 = vld [vmem:[%s4705_s13 + $0x68] sm:$0xff] }
 0xaef   : > { %3887 = vmatprep.subr.mxu1 %v2524_v15  ;;  %v3089_v7 = vld [vmem:[%s4705_s13 + $0x60] sm:$0xff] }
 0xaf0   : > { %v2760_v8 = vpop.f32.mrf.mxu0 }
 0xaf1   : > { %v2863_v9 = vpop.permute.xlu0 %2862  ;;  %v2767_v10 = vsel %vm1520_vm8, %v2760_v8, -inf }
 0xaf2   : > { %v3907_v21 = vpop.f32.mrf.mxu0  ;;  %2768 = vmax.xlane.f32.xlu1 %v2767_v10  ;;  %3914 = vmatpush3.msra.mxu0 %v2863_v9  ;;  %v3087_v9 = vld [vmem:[%s4705_s13 + $0x50] sm:$0xff]  ;;  %v3086_v10 = vld [vmem:[%s4705_s13 + $0x48] sm:$0xff] }
 0xaf3   : > { %3929 = vmatprep.subr.mxu0 %v3092_v0  ;;  %v3085_v21 = vld [vmem:[%s4705_s13 + $0x40] sm:$0xff] }
 0xaf7   : > { %v4121_v11 = vpop.eup %4120 }
 0xaf8   : > { %v2367_v13 = vmul.f32 %v4121_v11, %v4119_v63  ;;  %v3084_v11 = vld [vmem:[%s4705_s13 + $0x38] sm:$0xff] }
 0xafa   : > { %3880 = vmatmul.mubr.msk.f32.vlgmr.msra.gmra.mxu1 %vm1520_vm8, %v2367_v13  ;;  %v3083_v13 = vld [vmem:[%s4705_s13 + $0x30] sm:$0xff] }
 0xafb   : > { %3888 = vmatpush3.msra.mxu1 %v2524_v15  ;;  %v3082_v15 = vld [vmem:[%s4705_s13 + $0x28] sm:$0xff] }
 0xafc   : > { %3889 = vmatprep.subr.mxu1 %v2523_v16 }
 0xafd   : > { %3890 = vmatpush3.msra.mxu1 %v2523_v16  ;;  %v3081_v16 = vld [vmem:[%s4705_s13 + $0x20] sm:$0xff] }
 0xafe   : > { %3891 = vmatprep.subr.mxu1 %v2522_v20 }
 0xaff   : > { %3892 = vmatpush3.msra.mxu1 %v2522_v20  ;;  %v3080_v20 = vld [vmem:[%s4705_s13 + $0x18] sm:$0xff] }
 0xb00   : > { %3893 = vmatprep.subr.mxu1 %v2521_v22 }
 0xb01   : > { %3894 = vmatpush3.msra.mxu1 %v2521_v22  ;;  %v3079_v22 = vld [vmem:[%s4705_s13 + $0x10] sm:$0xff] }
 0xb02   : > { %3908 = vmatprep.subr.mxu1 %v4359_v17 }
 0xb77   : > { %v2766_v24 = vpop.xlane.xlu1 %2765 }
 0xb78   : > { %v2770_v25 = vsub.f32 %v2682_v4, %v2766_v24  ;;  %v3078_v24 = vld [vmem:[%s4705_s13 + $0x8] sm:$0xff] }
 0xb7a   : > { %v2772_v12 = vmul.f32 1.442695, %v2770_v25  ;;  %v3077_v25 = vld [vmem:[%s4705_s13] sm:$0xff] }
 0xb7b   : > { %v2769_v26 = vpop.xlane.xlu1 %2768 }
 0xb7c   : > { %4122 = vpow2.f32 %v2772_v12  ;;  %v2771_v28 = vsub.f32 %v2760_v8, %v2769_v26  ;;  %v3088_v8 = vld [vmem:[%s4705_s13 + $0x58] sm:$0xff]  ;;  %v3191_v26 = vld [vmem:[%s4749_s30 + $0x70] sm:$0xff] }
 0xb7d   : > { %v3192_v12 = vld [vmem:[%s4749_s30 + $0x78] sm:$0xff] }
 0xb7e   : > { %v2774_v29 = vmul.f32 1.442695, %v2771_v28  ;;  %v3190_v28 = vld [vmem:[%s4749_s30 + $0x68] sm:$0xff] }
 0xb80   : > { %4124 = vpow2.f32 %v2774_v29  ;;  %v3189_v29 = vld [vmem:[%s4749_s30 + $0x60] sm:$0xff] }
 0xb89   : > { %v4123_v30 = vpop.eup %4122 }
 0xb8a   : > { %v2776_v31 = vsel %vm1520_vm8, %v4123_v30, 0.0 }
 0xb8b   : > { %2777 = vadd.xlane.f32.xlu1 %v2776_v31  ;;  %v3187_v31 = vld [vmem:[%s4749_s30 + $0x50] sm:$0xff] }
 0xb8d   : > { %v4125_v32 = vpop.eup %4124 }
 0xb8e   : > { %v2779_v33 = vsel %vm1520_vm8, %v4125_v32, 0.0 }
 0xb8f   : > { %2780 = vadd.xlane.f32.xlu1 %v2779_v33  ;;  %v3185_v33 = vld [vmem:[%s4749_s30 + $0x40] sm:$0xff] }
 0xba0   : > { %2786 = vrot.lane.b32.xlu1 %v4870_v23, %s4363_s0 }
 0xbba   : > { %v2441_v34 = vpop.f32.mrf.mxu1 }
 0xbbb   : > { %3895 = vmatprep.mubr.msk.f32.mxu1 %vm1367_vm7, %v2441_v34  ;;  %v3184_v34 = vld [vmem:[%s4749_s30 + $0x38] sm:$0xff] }
 0xbbc   : > { %v3881_v35 = vpop.f32.mrf.mxu1  ;;  %3896 = vmatmul.mubr.msk.f32.vlgmr.msra.gmra.mxu1 %vm1367_vm7, %v2517_v1 }
 0xbbd   : > { %3910 = vmatprep.mubr.msk.f32.mxu1 %vm4360_vm6, %v4359_v17  ;;  %v2939_v17 = vld [vmem:[%s4703_s7 + $0x68] sm:$0xff]  ;;  %v3183_v35 = vld [vmem:[%s4749_s30 + $0x30] sm:$0xff]  ;;  %s4364_s7 = smov [#allocation11]  }
 0xbbe   : > { %s3325_s1 = sshll.u32 %s4364_s7, 4  ;;  %s3326_s1 = int_to_ptr.vmem [resolvable:$true] %s3325_s1 }
 0xbbf   : > { %p4283_p6 = scmp.lt.s32.totalorder %s3326_s1, %s3326_s1 }
 0xc14   : > { %v2778_v36 = vpop.xlane.xlu1 %2777 }
 0xc15   : > { %4126 = vrcp.f32 %v2778_v36  ;;  %v3182_v36 = vld [vmem:[%s4749_s30 + $0x28] sm:$0xff] }
 0xc18   : > { %v2781_v37 = vpop.xlane.xlu1 %2780 }
 0xc19   : > { %4128 = vrcp.f32 %v2781_v37  ;;  %v3181_v37 = vld [vmem:[%s4749_s30 + $0x20] sm:$0xff] }
 0xc1c   : > { %v2787_v41 = vpop.permute.xlu1 %2786 }
 0xc1d   : > { %3909 = vmatpush3.msra.mxu1 %v2787_v41 }
 0xc1e   : > { %3918 = vmatprep.subr.mxu1 %v2941_v38 }
 0xc22   : > { %v4127_v23 = vpop.eup %4126 }
 0xc23   : > { %v2784_v42 = vmul.f32 %v4127_v23, %v4123_v30  ;;  %v3188_v30 = vld [vmem:[%s4749_s30 + $0x58] sm:$0xff] }
 0xc25   : > { %3911 = vmatmul.mubr.msk.f32.vlgmr.msra.gmra.mxu1 %vm1520_vm8, %v2784_v42 }
 0xc26   : > { %v4129_v44 = vpop.eup %4128  ;;  %3919 = vmatpush3.msra.mxu1 %v2941_v38 }
 0xc27   : > { %v2785_v45 = vmul.f32 %v4129_v44, %v4125_v32  ;;  %3920 = vmatprep.subr.mxu1 %v2940_v43  ;;  %v3186_v32 = vld [vmem:[%s4749_s30 + $0x48] sm:$0xff] }
 0xc28   : > { %3921 = vmatpush3.msra.mxu1 %v2940_v43 }
 0xc29   : > { %3916 = vmatmul.mubr.msk.f32.vlgmr.msra.gmra.mxu0 %vm1520_vm8, %v2785_v45  ;;  %3922 = vmatprep.subr.mxu1 %v2939_v17 }
 0xc2a   : > { %3923 = vmatpush3.msra.mxu1 %v2939_v17  ;;  %3930 = vmatpush3.msra.mxu0 %v3092_v0  ;;  %v3595_v17 = vld [vmem:[%s5206_s16] ss:$0 sm:$0xff] }
 0xc2b   : > { %3924 = vmatprep.subr.mxu1 %v2938_v46  ;;  %3931 = vmatprep.subr.mxu0 %v3091_v40  ;;  %v3598_v0 = vld [vmem:[%s846_s3] ss:$0 sm:$0xff] }
 0xc2c   : > { %3925 = vmatpush3.msra.mxu1 %v2938_v46  ;;  %3932 = vmatpush3.msra.mxu0 %v3091_v40 }
 0xc2d   : > { %3933 = vmatprep.subr.mxu0 %v3090_v6  ;;  %3964 = vmatprep.subr.mxu1 %v3192_v12 }
 0xc2e   : > { %3934 = vmatpush3.msra.mxu0 %v3090_v6 }
 0xc2f   : > { %3935 = vmatprep.subr.mxu0 %v3089_v7 }
 0xc30   : > { %3936 = vmatpush3.msra.mxu0 %v3089_v7 }
 0xc31   : > { %3937 = vmatprep.subr.mxu0 %v3088_v8 }
 0xc32   : > { %3938 = vmatpush3.msra.mxu0 %v3088_v8 }
 0xc33   : > { %3939 = vmatprep.subr.mxu0 %v3087_v9 }
 0xc34   : > { %3940 = vmatpush3.msra.mxu0 %v3087_v9 }
 0xc35   : > { %3941 = vmatprep.subr.mxu0 %v3086_v10 }
 0xc36   : > { %3942 = vmatpush3.msra.mxu0 %v3086_v10 }
 0xc37   : > { %3943 = vmatprep.subr.mxu0 %v3085_v21 }
 0xc38   : > { %3944 = vmatpush3.msra.mxu0 %v3085_v21 }
 0xc39   : > { %3945 = vmatprep.subr.mxu0 %v3084_v11 }
 0xc3a   : > { %3946 = vmatpush3.msra.mxu0 %v3084_v11 }
 0xc3b   : > { %3947 = vmatprep.subr.mxu0 %v3083_v13 }
 0xc3c   : > { %3948 = vmatpush3.msra.mxu0 %v3083_v13 }
 0xc3d   : > { %3949 = vmatprep.subr.mxu0 %v3082_v15 }
 0xc3e   : > { %3950 = vmatpush3.msra.mxu0 %v3082_v15 }
 0xc3f   : > { %3951 = vmatprep.subr.mxu0 %v3081_v16 }
 0xc40   : > { %3952 = vmatpush3.msra.mxu0 %v3081_v16 }
 0xc41   : > { %3953 = vmatprep.subr.mxu0 %v3080_v20 }
 0xc42   : > { %3954 = vmatpush3.msra.mxu0 %v3080_v20 }
 0xc43   : > { %3955 = vmatprep.subr.mxu0 %v3079_v22 }
 0xc44   : > { %3956 = vmatpush3.msra.mxu0 %v3079_v22  ;;  %v3599_v22 = vld [vmem:[%s849_s18] ss:$0 sm:$0xff]  ;;  %s4276_s18 = scalar_lea.vmem %s3326_s1, 256 }
 0xc45   : > { %3957 = vmatprep.subr.mxu0 %v3078_v24  ;;  %p4277_p13 = scmp.ne.s32.totalorder %s3326_s1, %s4276_s18  ;;  %p4284_p0 = scmp.lt.s32.totalorder %s4276_s18, %s4276_s18 }
 0xc46   : > { %3958 = vmatpush3.msra.mxu0 %v3078_v24 }
 0xc47   : > { %3959 = vmatprep.subr.mxu0 %v3077_v25  ;;  %p4278_p1 = pnand %p4277_p13, %p4039_p11  ;;  %p4285_p4 = por %p4284_p0, %p4283_p6 }
 0xc48   : > { %3960 = vmatpush3.msra.mxu0 %v3077_v25  ;;  %v3600_v25 = vld [vmem:[%s852_s24] ss:$0 sm:$0xff] }
 0xc49   : > { %p4279_p3 = pneg %p4278_p1 }
 0xc4b   : > { %p4286_p8 = pnand %p4285_p4, %p4279_p3 }
 0xc7c   : > { %v3897_v48 = vpop.f32.mrf.mxu1 }
 0xc7d   : > { %v2607_v49 = vadd.f32 %v3897_v48, %v2188_v47  ;;  %v3596_v47 = vld [vmem:[%s5207_s17] ss:$0 sm:$0xff] }
 0xc7e   : > { %v2597_v19 = vpop.f32.mrf.mxu1 }
 0xc7f   : > { %v2606_v50 = vadd.f32 %v2597_v19, %v2183_v55  ;;  %v3179_v55 = vld [vmem:[%s4749_s30 + $0x10] sm:$0xff] }
 0xce5   : > { %v2858_v51 = vpop.f32.mrf.mxu1 }
 0xce6   : > { %3926 = vmatprep.mubr.msk.f32.mxu1 %vm1367_vm7, %v2858_v51 }
 0xce7   : > { %v3912_v52 = vpop.f32.mrf.mxu1 }
 0xce9   : > { %v2934_v53 = vpop.f32.mrf.mxu0 }
 0xcea   : > { %3927 = vmatmul.mubr.msk.f32.vlgmr.msra.gmra.mxu1 %vm1367_vm7, %v2934_v53 }
 0xceb   : > { %v3917_v54 = vpop.f32.mrf.mxu0  ;;  %3965 = vmatpush3.msra.mxu1 %v3192_v12 }
 0xcec   : > { %3966 = vmatprep.subr.mxu1 %v3191_v26  ;;  %v3180_v54 = vld [vmem:[%s4749_s30 + $0x18] sm:$0xff] }
 0xced   : > { %3967 = vmatpush3.msra.mxu1 %v3191_v26 }
 0xcee   : > { %3968 = vmatprep.subr.mxu1 %v3190_v28 }
 0xcef   : > { %3969 = vmatpush3.msra.mxu1 %v3190_v28 }
 0xcf0   : > { %3970 = vmatprep.subr.mxu1 %v3189_v29 }
 0xcf1   : > { %3971 = vmatpush3.msra.mxu1 %v3189_v29 }
 0xcf2   : > { %3972 = vmatprep.subr.mxu1 %v3188_v30 }
 0xcf3   : > { %3973 = vmatpush3.msra.mxu1 %v3188_v30 }
 0xcf4   : > { %3974 = vmatprep.subr.mxu1 %v3187_v31 }
 0xcf5   : > { %3975 = vmatpush3.msra.mxu1 %v3187_v31 }
 0xcf6   : > { %3976 = vmatprep.subr.mxu1 %v3186_v32 }
 0xcf7   : > { %3977 = vmatpush3.msra.mxu1 %v3186_v32 }
 0xcf8   : > { %3978 = vmatprep.subr.mxu1 %v3185_v33 }
 0xcf9   : > { %3979 = vmatpush3.msra.mxu1 %v3185_v33 }
 0xcfa   : > { %3980 = vmatprep.subr.mxu1 %v3184_v34 }
 0xcfb   : > { %3981 = vmatpush3.msra.mxu1 %v3184_v34 }
 0xcfc   : > { %3982 = vmatprep.subr.mxu1 %v3183_v35 }
 0xcfd   : > { %3983 = vmatpush3.msra.mxu1 %v3183_v35 }
 0xcfe   : > { %3984 = vmatprep.subr.mxu1 %v3182_v36 }
 0xcff   : > { %3985 = vmatpush3.msra.mxu1 %v3182_v36 }
 0xd00   : > { %3986 = vmatprep.subr.mxu1 %v3181_v37 }
 0xd01   : > { %3987 = vmatpush3.msra.mxu1 %v3181_v37 }
 0xd02   : > { %3988 = vmatprep.subr.mxu1 %v3180_v54 }
 0xd03   : > { %3989 = vmatpush3.msra.mxu1 %v3180_v54 }
 0xd04   : > { %3990 = vmatprep.subr.mxu1 %v3179_v55 }
 0xd05   : > { %3991 = vmatpush3.msra.mxu1 %v3179_v55 }
 0xdaa   : > { %v3928_v56 = vpop.f32.mrf.mxu1 }
 0xdab   : > { %v3024_v57 = vadd.f32 %v3928_v56, %v2607_v49  ;;  %v3178_v56 = vld [vmem:[%s4749_s30 + $0x8] sm:$0xff] }
 0xdac   : > { %v3014_v18 = vpop.f32.mrf.mxu1  ;;  %3992 = vmatprep.subr.mxu1 %v3178_v56 }
 0xdad   : > { %v3033_v58 = vadd.f32 %v3594_v39, %v3024_v57  ;;  %v3023_v59 = vadd.f32 %v3014_v18, %v2606_v50  ;;  %3993 = vmatpush3.msra.mxu1 %v3178_v56  ;;  %v3597_v50 = vld [vmem:[%s843_s21] ss:$0 sm:$0xff] }
 0xdaf   : > { %v3032_v61 = vadd.f32 %v3594_v39, %v3023_v59  ;;  %v3035_v62 = vadd.f32 %v3033_v58, %v4828_v60  ;;  %v3177_v39 = vld [vmem:[%s4749_s30] sm:$0xff] }
 0xdb0   : > { %3994 = vmatprep.subr.mxu1 %v3177_v39 }
 0xdb1   : > { %3040 = vadd.xlane.f32.xlu1 %v3035_v62  ;;  %v3034_v63 = vadd.f32 %v3032_v61, %v4791_v27  ;;  %3995 = vmatpush3.msra.mxu1 %v3177_v39 }
 0xdb3   : > { %3038 = vadd.xlane.f32.xlu0 %v3034_v63 }
 0xe3a   : > { %v3041_v14 = vpop.xlane.xlu1 %3040 }
 0xe3b   : > { %v3044_v2 = vmul.f32 0.0078125, %v3041_v14 }
 0xe3c   : > { %v3039_v1 = vpop.xlane.xlu0 %3038 }
 0xe3d   : > { %v3043_v3 = vmul.f32 0.0078125, %v3039_v1  ;;  %v5028_v60 = vsub.f32 %v3035_v62, %v3044_v2 }
 0xe3f   : > { %v5026_v4 = vsub.f32 %v3034_v63, %v3043_v3  ;;  %v3048_v5 = vmul.f32 %v5028_v60, %v5028_v60 }
 0xe41   : > { %v3047_v27 = vmul.f32 %v5026_v4, %v5026_v4 }
 0xe43   : > { %3049 = vadd.xlane.f32.xlu0 %v3047_v27 }
 0xe47   : > { %3051 = vadd.xlane.f32.xlu0 %v3048_v5 }
 0xecc   : > { %v3050_v38 = vpop.xlane.xlu0 %3049 }
 0xecd   : > { %v3053_v41 = vmul.f32 0.0078125, %v3050_v38 }
 0xecf   : > { %v3055_v23 = vadd.f32 1e-05, %v3053_v41 }
 0xed0   : > { %v3052_v42 = vpop.xlane.xlu0 %3051 }
 0xed1   : > { %4130 = vrsqrt.f32 %v3055_v23  ;;  %v3054_v43 = vmul.f32 0.0078125, %v3052_v42 }
 0xed3   : > { %v3056_v44 = vadd.f32 1e-05, %v3054_v43 }
 0xed5   : > { %4132 = vrsqrt.f32 %v3056_v44 }
 0xede   : > { %v4131_v45 = vpop.eup %4130 }
 0xedf   : > { %v3059_v46 = vmul.f32 %v4131_v45, %v5026_v4 }
 0xee1   : > { %v3067_v48 = vmul.f32 %v3595_v17, %v3059_v46 }
 0xee2   : > { %v4133_v49 = vpop.eup %4132 }
 0xee3   : > { %v3060_v19 = vmul.f32 %v4133_v49, %v5028_v60  ;;  %v3075_v51 = vadd.f32 %v3596_v47, %v3067_v48 }
 0xee5   : > { %v3068_v52 = vmul.f32 %v3595_v17, %v3060_v19  ;;  %3961 = vmatprep.mubr.f32.mxu0 %v3075_v51 }
 0xee7   : > { %v3076_v53 = vadd.f32 %v3596_v47, %v3068_v52 }
 0xee9   : > { %3962 = vmatmul.mubr.f32.vlgmr.msra.gmra.mxu0 %v3076_v53 }
 0xfa9   : > { %v3963_v57 = vpop.f32.mrf.mxu0 }
 0xfaa   : > { %v3172_v18 = vadd.f32 %v3963_v57, %v3597_v50 }
 0xfab   : > { %v3166_v58 = vpop.f32.mrf.mxu0 }
 0xfac   : > { %v3167_v59 = vadd.f32 %v3597_v50, %v3166_v58  ;;  %v3176_v62 = vmax.f32 %v3172_v18, 0.0 }
 0xfae   : > { %v3175_v61 = vmax.f32 %v3167_v59, 0.0 }
 0xfb0   : > { %3996 = vmatprep.mubr.f32.mxu1 %v3175_v61 }
 0xfb1   : > { %3997 = vmatmul.mubr.f32.vlgmr.msra.gmra.mxu1 %v3176_v62 }
0x1071   : > { %v3998_v63 = vpop.f32.mrf.mxu1 }
0x1072   : > { %v3272_v1 = vadd.f32 %v3998_v63, %v3598_v0 }
0x1073   : > { %v3266_v40 = vpop.f32.mrf.mxu1 }
0x1074   : > { %v3267_v14 = vadd.f32 %v3598_v0, %v3266_v40  ;;  %v3276_v3 = vadd.f32 %v3272_v1, %v3076_v53 }
0x1076   : > { %v3275_v2 = vadd.f32 %v3267_v14, %v3075_v51 }
0x1078   : > { %3279 = vadd.xlane.f32.xlu0 %v3275_v2 }
0x107c   : > { %3281 = vadd.xlane.f32.xlu0 %v3276_v3 }
0x1101   : > { %v3280_v4 = vpop.xlane.xlu0 %3279 }
0x1102   : > { %v3283_v60 = vmul.f32 0.0078125, %v3280_v4 }
0x1104   : > { %v3285_v27 = vsub.f32 %v3275_v2, %v3283_v60 }
0x1105   : > { %v3282_v5 = vpop.xlane.xlu0 %3281 }
0x1106   : > { %v3284_v6 = vmul.f32 0.0078125, %v3282_v5  ;;  %v3287_v7 = vmul.f32 %v3285_v27, %v3285_v27 }
0x1108   : > { %v3286_v8 = vsub.f32 %v3276_v3, %v3284_v6  ;;  %3289 = vadd.xlane.f32.xlu0 %v3287_v7 }
0x110a   : > { %v3288_v9 = vmul.f32 %v3286_v8, %v3286_v8 }
0x110c   : > { %3291 = vadd.xlane.f32.xlu1 %v3288_v9 }
0x1191   : > { %v3290_v10 = vpop.xlane.xlu0 %3289 }
0x1192   : > { %v3293_v21 = vmul.f32 0.0078125, %v3290_v10 }
0x1194   : > { %v3295_v11 = vadd.f32 1e-05, %v3293_v21 }
0x1195   : > { %v3292_v13 = vpop.xlane.xlu1 %3291 }
0x1196   : > { %4134 = vrsqrt.f32 %v3295_v11  ;;  %v3294_v15 = vmul.f32 0.0078125, %v3292_v13 }
0x1198   : > { %v3296_v16 = vadd.f32 1e-05, %v3294_v15 }
0x119a   : > { %4136 = vrsqrt.f32 %v3296_v16 }
0x11a3   : > { %v4135_v20 = vpop.eup %4134 }
0x11a4   : > { %v3299_v24 = vmul.f32 %v4135_v20, %v3285_v27 }
0x11a6   : > { %v3307_v12 = vmul.f32 %v3599_v22, %v3299_v24 }
0x11a7   : > { %v4137_v26 = vpop.eup %4136 }
0x11a8   : > { %v3300_v28 = vmul.f32 %v4137_v26, %v3286_v8  ;;  %v3315_v29 = vadd.f32 %v3600_v25, %v3307_v12 }
0x11aa   : > { %v3308_v30 = vmul.f32 %v3599_v22, %v3300_v28  ;;  %3317 = vst [vmem:[#allocation11] sm:$0xff] %v3315_v29 }
0x11ac   : > { %v3316_v31 = vadd.f32 %v3600_v25, %v3308_v30 }
0x11ae   : > { %3318 = vst [vmem:[#allocation11 + $0x8] sm:$0xff] %v3316_v31 }
0x11af   : > { %4289 = shalt.err (!%p4286_p8)
}
0x11b0   : > { %s4365_s4 = smov 128   ;;  %s4366_s24 = smov 8  }
0x11b1   : > { %s5211_s28 = sld [smem:[#allocation34_spill]] }
0x11b7   : > { %4016 = dma.vmem_to_hbm [thread:$0]  (%p4039_p11), %s3326_s1, 256, %s5211_s28, [#allocation4], %s4365_s4, %s4365_s4, %s4366_s24  }
0x11b8   : > { %4329 = dma.done.wait (%p4039_p11), [#allocation4], 256  }
0x11b9   : > { %4331 = vsyncadd (%p4039_p11), [#allocation4], 4294967040 }
0x11ba PF: > { %s5212_s21 = sld [smem:[#allocation18_spill]] }
0x11bb   : > { %s5213_s0 = sld [smem:[#allocation16_spill]] }
0x11bc   : > { %s5214_s30 = sld [smem:[#allocation17_spill]] }
0x11bd   : > { %s5215_s20 = sld [smem:[#allocation19_spill]] }
0x11c0   : > { %p34_p7 = scmp.ge.s32.totalorder %s5212_s21, 6  }
0x11c2   :  { %36 = sbr.rel (!%p34_p7) target bundleno = 23 (0x17), region = 201 }
0x11c7   :  { %3341 = vsyncpa [#allocation3], 1 }
0x11c8   :  { %3343 = vsyncpa [#allocation3 + $0x1], 1 }
0x11c9   :  { %3344 = vsyncpa [#allocation6], 1 }
0x11ca   :  { %3346 = vsyncpa [#allocation6 + $0x1], 1 }
0x11cb   :  { %3347 = vsyncpa [#allocation9], 1 }
0x11cc   :  { %3349 = vsyncpa [#allocation9 + $0x1], 1 }
0x11cd   :  { %3350 = vsyncpa [#allocation4], 1 }
0x11ce   :  { %3352 = vsyncpa [#allocation4 + $0x1], 1 }

</bundles_post_ra>
